<compile_context>
chip_gen: v7x
topology: tpu7x:2x2x1
jax: 0.10.0
libtpu: 0.0.40
codegen_flags: <defaults>
</compile_context>

<pallas_src>
import math

import jax
import jax.numpy as jnp
from jax import lax
from jax.experimental import pallas as pl
from jax.experimental.pallas import tpu as pltpu

# ---------------- config (synthetic small RoBERTa) ----------------
VOCAB = 100
HIDDEN = 32
N_HEADS = 4
HEAD_DIM = HIDDEN // N_HEADS
N_LAYERS = 2
INTERMEDIATE = 64
MAX_POS = 32
PAD_IDX = 1          # RoBERTa padding_idx
LN_EPS = 1e-5
BBLK = 2             # sequences per grid step (use ~16 at real sizes -> M=128)


# ---------------- fused encoder kernel ----------------
def _encoder_kernel(emb_ref, bias_ref, eg_ref, eb_ref,
                    wqkv_ref, bqkv_ref, wo_ref, bo_ref,
                    ln1g_ref, ln1b_ref,
                    w1_ref, b1_ref, w2_ref, b2_ref,
                    ln2g_ref, ln2b_ref,
                    out_ref, x_ref):
    """Grid = (batch blocks, layers). One step = one layer over BBLK sequences."""
    f32 = jnp.float32
    bf16 = jnp.bfloat16
    BB = bias_ref.shape[0]            # sequences in this block
    S = bias_ref.shape[2]
    R, H = x_ref.shape                # R = BB * S
    li = pl.program_id(1)
    n_layers = pl.num_programs(1)
    scale = 1.0 / math.sqrt(HEAD_DIM)

    def layer_norm(x, g, b):
        mu = jnp.mean(x, axis=-1, keepdims=True)
        d = x - mu
        var = jnp.mean(d * d, axis=-1, keepdims=True)
        return d * lax.rsqrt(var + LN_EPS) * g + b

    def gelu_erf(x):
        # exact-GELU via erf; erf from Abramowitz & Stegun 7.1.26 (|err|<1.5e-7)
        # TODO(synk): swap for jax.nn.gelu(approximate=False) once lax.erf
        # Mosaic lowering is confirmed on the target jax version.
        z = x * (1.0 / math.sqrt(2.0))
        az = jnp.abs(z)
        t = 1.0 / (1.0 + 0.3275911 * az)
        poly = ((((1.061405429 * t - 1.453152027) * t + 1.421413741) * t
                 - 0.284496736) * t + 0.254829592) * t
        erf_abs = 1.0 - poly * jnp.exp(-az * az)
        erf = jnp.where(z >= 0.0, erf_abs, -erf_abs)
        return 0.5 * x * (1.0 + erf)

    # ---- first layer: embedding LayerNorm into the carried hidden state ----
    @pl.when(li == 0)
    def _():
        x_ref[...] = layer_norm(emb_ref[...], eg_ref[...], eb_ref[...])

    x = x_ref[...]                                            # (R, H) f32

    # key-mask bias: broadcast once per layer (outside head loop), already f32
    bias = jnp.broadcast_to(bias_ref[...], (BB, S, S))        # (BB, S, S)

    # ---- attention: fused QKV projection over all BB*S rows ----
    qkv = jnp.dot(x.astype(bf16), wqkv_ref[0],
                  preferred_element_type=f32) + bqkv_ref[0]   # (R, 3H) f32
    qkv = qkv.reshape(BB, S, 3 * H)

    ctx_heads = []
    for h in range(N_HEADS):
        lo = h * HEAD_DIM
        q = qkv[:, :, lo:lo + HEAD_DIM].astype(bf16)                    # (BB,S,Dh)
        k = qkv[:, :, H + lo:H + lo + HEAD_DIM].astype(bf16)
        v = qkv[:, :, 2 * H + lo:2 * H + lo + HEAD_DIM].astype(bf16)
        # batched over the BB sequences in one dot_general (no K transpose)
        s = jnp.einsum('bqd,bkd->bqk', q, k,
                       preferred_element_type=f32) * scale              # (BB,S,S)
        s = s + bias
        s = s - jnp.max(s, axis=-1, keepdims=True)
        p = jnp.exp(s)
        p = p / jnp.sum(p, axis=-1, keepdims=True)                      # exact div
        ctx_heads.append(jnp.einsum('bqk,bkd->bqd', p.astype(bf16), v,
                                    preferred_element_type=f32))        # (BB,S,Dh)
    # single output projection over all rows (replaces per-head folded matmuls)
    ctx = jnp.concatenate(ctx_heads, axis=-1).reshape(R, H)
    attn = jnp.dot(ctx.astype(bf16), wo_ref[0],
                   preferred_element_type=f32) + bo_ref[0]
    x = layer_norm(attn + x, ln1g_ref[0], ln1b_ref[0])

    # ---- FFN ----
    hcur = jnp.dot(x.astype(bf16), w1_ref[0],
                   preferred_element_type=f32) + b1_ref[0]
    hcur = gelu_erf(hcur)
    ffn = jnp.dot(hcur.astype(bf16), w2_ref[0],
                  preferred_element_type=f32) + b2_ref[0]
    x = layer_norm(ffn + x, ln2g_ref[0], ln2b_ref[0])

    x_ref[...] = x

    # ---- last layer: emit CLS token (row 0 of each sequence) ----
    @pl.when(li == n_layers - 1)
    def _():
        out_ref[...] = x.reshape(BB, S, H)[:, 0:1, :].astype(out_ref.dtype)


def encoder_cls(emb, bias, eg, eb, wqkv, bqkv, wo, bo,
                ln1g, ln1b, w1, b1, w2, b2, ln2g, ln2b):
    B, S, H = emb.shape
    L = wqkv.shape[0]
    I = w1.shape[2]
    bblk = BBLK if B % BBLK == 0 else 1
    emb_flat = emb.reshape(B * S, H)                  # flatten in the wrapper

    cst = lambda b, l: (0, 0)
    per_layer = lambda b, l: (l, 0, 0)
    out = pl.pallas_call(
        _encoder_kernel,
        out_shape=jax.ShapeDtypeStruct((B, 1, H), jnp.float32),
        grid=(B // bblk, L),
        in_specs=[
            pl.BlockSpec((bblk * S, H), lambda b, l: (b, 0)),   # emb (flattened)
            pl.BlockSpec((bblk, 1, S), lambda b, l: (b, 0, 0)), # mask bias
            pl.BlockSpec((1, H), cst),                          # emb LN gamma
            pl.BlockSpec((1, H), cst),                          # emb LN beta
            pl.BlockSpec((1, H, 3 * H), per_layer),             # wqkv (bf16)
            pl.BlockSpec((1, 1, 3 * H), per_layer),             # bqkv
            pl.BlockSpec((1, H, H), per_layer),                 # wo (bf16)
            pl.BlockSpec((1, 1, H), per_layer),                 # bo
            pl.BlockSpec((1, 1, H), per_layer),                 # attn LN gamma
            pl.BlockSpec((1, 1, H), per_layer),                 # attn LN beta
            pl.BlockSpec((1, H, I), per_layer),                 # w1 (bf16)
            pl.BlockSpec((1, 1, I), per_layer),                 # b1
            pl.BlockSpec((1, I, H), per_layer),                 # w2 (bf16)
            pl.BlockSpec((1, 1, H), per_layer),                 # b2
            pl.BlockSpec((1, 1, H), per_layer),                 # ffn LN gamma
            pl.BlockSpec((1, 1, H), per_layer),                 # ffn LN beta
        ],
        out_specs=pl.BlockSpec((bblk, 1, H), lambda b, l: (b, 0, 0)),
        scratch_shapes=[pltpu.VMEM((bblk * S, H), jnp.float32)],  # carried x
        compiler_params=pltpu.CompilerParams(
            dimension_semantics=("parallel", "arbitrary"),   # megacore on batch
            vmem_limit_bytes=64 * 1024 * 1024),
    )(emb_flat, bias, eg, eb, wqkv, bqkv, wo, bo,
      ln1g, ln1b, w1, b1, w2, b2, ln2g, ln2b)
    return out[:, 0, :]


# ---------------- deterministic parameter init ----------------
def init_params(key):
    def nrm(k, shape):
        return 0.02 * jax.random.normal(k, shape, dtype=jnp.float32)

    keys = jax.random.split(key, 4 + N_LAYERS)
    params = {
        "word_emb": nrm(keys[0], (VOCAB, HIDDEN)),
        "pos_emb": nrm(keys[1], (MAX_POS, HIDDEN)),
        "type_emb": nrm(keys[2], (1, HIDDEN)),
        "emb_ln_g": jnp.ones((HIDDEN,), jnp.float32),
        "emb_ln_b": jnp.zeros((HIDDEN,), jnp.float32),
        "layers": [],
    }
    for li in range(N_LAYERS):
        lk = jax.random.split(keys[4 + li], 6)
        params["layers"].append({
            "wq": nrm(lk[0], (HIDDEN, HIDDEN)), "bq": jnp.zeros((HIDDEN,), jnp.float32),
            "wk": nrm(lk[1], (HIDDEN, HIDDEN)), "bk": jnp.zeros((HIDDEN,), jnp.float32),
            "wv": nrm(lk[2], (HIDDEN, HIDDEN)), "bv": jnp.zeros((HIDDEN,), jnp.float32),
            "wo": nrm(lk[3], (HIDDEN, HIDDEN)), "bo": jnp.zeros((HIDDEN,), jnp.float32),
            "attn_ln_g": jnp.ones((HIDDEN,), jnp.float32),
            "attn_ln_b": jnp.zeros((HIDDEN,), jnp.float32),
            "w1": nrm(lk[4], (HIDDEN, INTERMEDIATE)),
            "b1": jnp.zeros((INTERMEDIATE,), jnp.float32),
            "w2": nrm(lk[5], (INTERMEDIATE, HIDDEN)),
            "b2": jnp.zeros((HIDDEN,), jnp.float32),
            "ffn_ln_g": jnp.ones((HIDDEN,), jnp.float32),
            "ffn_ln_b": jnp.zeros((HIDDEN,), jnp.float32),
        })
    return params


# ---------------- TextCLS.forward equivalent ----------------
def text_cls_forward(params, input_ids, mask):
    B, S = input_ids.shape

    # HF RoBERTa position ids: computed from non-pad tokens of input_ids
    ne = (input_ids != PAD_IDX).astype(jnp.int32)
    position_ids = jnp.cumsum(ne, axis=1) * ne + PAD_IDX

    words = jnp.take(params["word_emb"], input_ids, axis=0)        # (B, S, H)
    pos = jnp.take(params["pos_emb"], position_ids, axis=0)        # (B, S, H)
    typ = params["type_emb"][0][None, None, :]                     # (1, 1, H)
    emb = words + pos + typ                                        # (B, S, H)

    # additive attention-mask bias over key positions
    bias = ((1.0 - mask.astype(jnp.float32)) * jnp.float32(-1e9)).reshape(B, 1, S)

    bf16 = jnp.bfloat16

    # stack per-layer weights with a leading layer dim; matmul weights in bf16
    def st(fn, dtype=jnp.float32):
        return jnp.stack([fn(l) for l in params["layers"]], axis=0).astype(dtype)

    wqkv = st(lambda l: jnp.concatenate([l["wq"], l["wk"], l["wv"]], axis=1), bf16)
    bqkv = st(lambda l: jnp.concatenate(
        [l["bq"], l["bk"], l["bv"]]).reshape(1, 3 * HIDDEN))
    wo = st(lambda l: l["wo"], bf16)
    bo = st(lambda l: l["bo"].reshape(1, HIDDEN))
    ln1g = st(lambda l: l["attn_ln_g"].reshape(1, HIDDEN))
    ln1b = st(lambda l: l["attn_ln_b"].reshape(1, HIDDEN))
    w1 = st(lambda l: l["w1"], bf16)
    b1 = st(lambda l: l["b1"].reshape(1, INTERMEDIATE))
    w2 = st(lambda l: l["w2"], bf16)
    b2 = st(lambda l: l["b2"].reshape(1, HIDDEN))
    ln2g = st(lambda l: l["ffn_ln_g"].reshape(1, HIDDEN))
    ln2b = st(lambda l: l["ffn_ln_b"].reshape(1, HIDDEN))
    eg = params["emb_ln_g"].reshape(1, HIDDEN)
    eb = params["emb_ln_b"].reshape(1, HIDDEN)

    return encoder_cls(emb, bias, eg, eb, wqkv, bqkv, wo, bo,
                       ln1g, ln1b, w1, b1, w2, b2, ln2g, ln2b)


if __name__ == "__main__":
    key = jax.random.PRNGKey(0)
    kp, ki = jax.random.split(key)
    params = init_params(kp)

    B, S = 4, 8
    input_ids = jax.random.randint(ki, (B, S), minval=3, maxval=VOCAB, dtype=jnp.int32)
    mask = jnp.ones((B, S), dtype=jnp.int32)
    mask = mask.at[1, S - 2:].set(0).at[3, S - 3:].set(0)   # pad tails
    input_ids = jnp.where(mask == 1, input_ids, PAD_IDX)

    fwd = jax.jit(text_cls_forward)
    cls = fwd(params, input_ids, mask)
    cls = jax.block_until_ready(cls)
    assert cls.shape == (B, HIDDEN) and cls.dtype == jnp.float32
    print("KERNEL_OK")
</pallas_src>

<mosaic_0001>
module attributes {stable_mosaic.version = 11 : i64} {
  func.func @_encoder_kernel(%arg0: i32, %arg1: i32, %arg2: memref<16x32xf32, #tpu.memory_space<vmem>>, %arg3: memref<2x1x8xf32, #tpu.memory_space<vmem>>, %arg4: memref<1x32xf32, #tpu.memory_space<vmem>>, %arg5: memref<1x32xf32, #tpu.memory_space<vmem>>, %arg6: memref<1x32x96xbf16, #tpu.memory_space<vmem>>, %arg7: memref<1x1x96xf32, #tpu.memory_space<vmem>>, %arg8: memref<1x32x32xbf16, #tpu.memory_space<vmem>>, %arg9: memref<1x1x32xf32, #tpu.memory_space<vmem>>, %arg10: memref<1x1x32xf32, #tpu.memory_space<vmem>>, %arg11: memref<1x1x32xf32, #tpu.memory_space<vmem>>, %arg12: memref<1x32x64xbf16, #tpu.memory_space<vmem>>, %arg13: memref<1x1x64xf32, #tpu.memory_space<vmem>>, %arg14: memref<1x64x32xbf16, #tpu.memory_space<vmem>>, %arg15: memref<1x1x32xf32, #tpu.memory_space<vmem>>, %arg16: memref<1x1x32xf32, #tpu.memory_space<vmem>>, %arg17: memref<1x1x32xf32, #tpu.memory_space<vmem>>, %arg18: memref<2x1x32xf32, #tpu.memory_space<vmem>>, %arg19: memref<16x32xf32, #tpu.memory_space<vmem>>) attributes {dimension_semantics = [#tpu.dimension_semantics<parallel>, #tpu.dimension_semantics<arbitrary>], iteration_bounds = array<i64: 2, 2>, scalar_prefetch = 0 : i64, scratch_operands = 1 : i64, tpu.core_type = #tpu.core_type<tc>, window_params = [{transform_indices = @transform_0, window_bounds = array<i64: 16, 32>}, {transform_indices = @transform_1, window_bounds = array<i64: 2, 1, 8>}, {pipeline_mode = #tpu.pipeline_mode<synchronous>, transform_indices = @transform_2, window_bounds = array<i64: 1, 32>}, {pipeline_mode = #tpu.pipeline_mode<synchronous>, transform_indices = @transform_3, window_bounds = array<i64: 1, 32>}, {transform_indices = @transform_4, window_bounds = array<i64: 1, 32, 96>}, {transform_indices = @transform_5, window_bounds = array<i64: 1, 1, 96>}, {transform_indices = @transform_6, window_bounds = array<i64: 1, 32, 32>}, {transform_indices = @transform_7, window_bounds = array<i64: 1, 1, 32>}, {transform_indices = @transform_8, window_bounds = array<i64: 1, 1, 32>}, {transform_indices = @transform_9, window_bounds = array<i64: 1, 1, 32>}, {transform_indices = @transform_10, window_bounds = array<i64: 1, 32, 64>}, {transform_indices = @transform_11, window_bounds = array<i64: 1, 1, 64>}, {transform_indices = @transform_12, window_bounds = array<i64: 1, 64, 32>}, {transform_indices = @transform_13, window_bounds = array<i64: 1, 1, 32>}, {transform_indices = @transform_14, window_bounds = array<i64: 1, 1, 32>}, {transform_indices = @transform_15, window_bounds = array<i64: 1, 1, 32>}, {transform_indices = @transform_16, window_bounds = array<i64: 2, 1, 32>}]} {
    %c0_i32 = arith.constant 0 : i32
    %0 = arith.cmpi eq, %arg1, %c0_i32 : i32
    %1 = arith.extui %0 : i1 to i32
    %c0_i32_0 = arith.constant 0 : i32
    %2 = arith.cmpi ne, %1, %c0_i32_0 : i32
    scf.if %2 {
      %c0_92 = arith.constant 0 : index
      %c0_93 = arith.constant 0 : index
      %220 = vector.load %arg2[%c0_92, %c0_93] : memref<16x32xf32, #tpu.memory_space<vmem>>, vector<16x32xf32>
      %c0_94 = arith.constant 0 : index
      %c0_95 = arith.constant 0 : index
      %221 = vector.load %arg4[%c0_94, %c0_95] : memref<1x32xf32, #tpu.memory_space<vmem>>, vector<1x32xf32>
      %c0_96 = arith.constant 0 : index
      %c0_97 = arith.constant 0 : index
      %222 = vector.load %arg5[%c0_96, %c0_97] : memref<1x32xf32, #tpu.memory_space<vmem>>, vector<1x32xf32>
      %cst_98 = arith.constant dense<0.000000e+00> : vector<16xf32>
      %223 = vector.multi_reduction <add>, %220, %cst_98 [1] : vector<16x32xf32> to vector<16xf32>
      %224 = vector.shape_cast %223 : vector<16xf32> to vector<16x1xf32>
      %cst_99 = arith.constant 3.200000e+01 : f32
      %225 = vector.broadcast %cst_99 : f32 to vector<16x1xf32>
      %226 = arith.divf %224, %225 : vector<16x1xf32>
      %227 = vector.broadcast %226 : vector<16x1xf32> to vector<16x32xf32>
      %228 = arith.subf %220, %227 : vector<16x32xf32>
      %229 = arith.mulf %228, %228 : vector<16x32xf32>
      %cst_100 = arith.constant dense<0.000000e+00> : vector<16xf32>
      %230 = vector.multi_reduction <add>, %229, %cst_100 [1] : vector<16x32xf32> to vector<16xf32>
      %231 = vector.shape_cast %230 : vector<16xf32> to vector<16x1xf32>
      %cst_101 = arith.constant 3.200000e+01 : f32
      %232 = vector.broadcast %cst_101 : f32 to vector<16x1xf32>
      %233 = arith.divf %231, %232 : vector<16x1xf32>
      %cst_102 = arith.constant 9.99999974E-6 : f32
      %234 = vector.broadcast %cst_102 : f32 to vector<16x1xf32>
      %235 = arith.addf %233, %234 : vector<16x1xf32>
      %236 = math.rsqrt %235 : vector<16x1xf32>
      %237 = vector.broadcast %236 : vector<16x1xf32> to vector<16x32xf32>
      %238 = arith.mulf %228, %237 : vector<16x32xf32>
      %239 = vector.broadcast %221 : vector<1x32xf32> to vector<16x32xf32>
      %240 = arith.mulf %238, %239 : vector<16x32xf32>
      %241 = vector.broadcast %222 : vector<1x32xf32> to vector<16x32xf32>
      %242 = arith.addf %240, %241 : vector<16x32xf32>
      %c0_103 = arith.constant 0 : index
      %c0_104 = arith.constant 0 : index
      %243 = vector.load %arg19[%c0_103, %c0_104] : memref<16x32xf32, #tpu.memory_space<vmem>>, vector<16x32xf32>
      tpu.vector_store %arg19[%c0_103, %c0_104], %242 {strides = array<i32>} : memref<16x32xf32, #tpu.memory_space<vmem>>, vector<16x32xf32>,
    } else {
    }
    %c0 = arith.constant 0 : index
    %c0_1 = arith.constant 0 : index
    %3 = vector.load %arg19[%c0, %c0_1] : memref<16x32xf32, #tpu.memory_space<vmem>>, vector<16x32xf32>
    %c0_2 = arith.constant 0 : index
    %c0_3 = arith.constant 0 : index
    %c0_4 = arith.constant 0 : index
    %4 = vector.load %arg3[%c0_2, %c0_3, %c0_4] : memref<2x1x8xf32, #tpu.memory_space<vmem>>, vector<2x1x8xf32>
    %5 = vector.shape_cast %4 : vector<2x1x8xf32> to vector<2x1x8xf32>
    %6 = vector.broadcast %5 : vector<2x1x8xf32> to vector<2x8x8xf32>
    %7 = arith.truncf %3 : vector<16x32xf32> to vector<16x32xbf16>
    %c0_5 = arith.constant 0 : index
    %c0_6 = arith.constant 0 : index
    %c0_7 = arith.constant 0 : index
    %8 = vector.load %arg6[%c0_5, %c0_6, %c0_7] : memref<1x32x96xbf16, #tpu.memory_space<vmem>>, vector<1x32x96xbf16>
    %9 = vector.shape_cast %8 : vector<1x32x96xbf16> to vector<32x96xbf16>
    %cst = arith.constant dense<0.000000e+00> : vector<16x96xf32>
    %10 = tpu.matmul %7, %9, %cst {dimension_numbers = #tpu.dot_dimension_numbers<[1], [0], [0], [1], [0, 0, 1, 1], [], []>} : vector<16x32xbf16>, vector<32x96xbf16>, vector<16x96xf32> -> vector<16x96xf32>
    %c0_8 = arith.constant 0 : index
    %c0_9 = arith.constant 0 : index
    %c0_10 = arith.constant 0 : index
    %11 = vector.load %arg7[%c0_8, %c0_9, %c0_10] : memref<1x1x96xf32, #tpu.memory_space<vmem>>, vector<1x1x96xf32>
    %12 = vector.shape_cast %11 : vector<1x1x96xf32> to vector<1x96xf32>
    %13 = vector.broadcast %12 : vector<1x96xf32> to vector<16x96xf32>
    %14 = arith.addf %10, %13 : vector<16x96xf32>
    %15 = vector.shape_cast %14 : vector<16x96xf32> to vector<2x8x96xf32>
    %16 = vector.extract_strided_slice %15 {offsets = [0, 0, 0], sizes = [2, 8, 8], strides = [1, 1, 1]} : vector<2x8x96xf32> to vector<2x8x8xf32>
    %17 = arith.truncf %16 : vector<2x8x8xf32> to vector<2x8x8xbf16>
    %18 = vector.extract_strided_slice %15 {offsets = [0, 0, 32], sizes = [2, 8, 8], strides = [1, 1, 1]} : vector<2x8x96xf32> to vector<2x8x8xf32>
    %19 = arith.truncf %18 : vector<2x8x8xf32> to vector<2x8x8xbf16>
    %20 = vector.extract_strided_slice %15 {offsets = [0, 0, 64], sizes = [2, 8, 8], strides = [1, 1, 1]} : vector<2x8x96xf32> to vector<2x8x8xf32>
    %21 = arith.truncf %20 : vector<2x8x8xf32> to vector<2x8x8xbf16>
    "tpu.trace_start"() <{level = 10 : i32, message = "bqd,bkd->bqk"}> : () -> ()
    %cst_11 = arith.constant dense<0.000000e+00> : vector<2x8x8xf32>
    %22 = tpu.matmul %17, %19, %cst_11 {dimension_numbers = #tpu.dot_dimension_numbers<[2], [2], [1], [1], [0, 0, 0, 1, 1, 1], [0], [0]>} : vector<2x8x8xbf16>, vector<2x8x8xbf16>, vector<2x8x8xf32> -> vector<2x8x8xf32>
    "tpu.trace_stop"() : () -> ()
    %cst_12 = arith.constant 0.353553385 : f32
    %23 = vector.broadcast %cst_12 : f32 to vector<2x8x8xf32>
    %24 = arith.mulf %22, %23 : vector<2x8x8xf32>
    %25 = arith.addf %24, %6 : vector<2x8x8xf32>
    %cst_13 = arith.constant dense<0xFF800000> : vector<2x8xf32>
    %26 = vector.multi_reduction <maximumf>, %25, %cst_13 [2] : vector<2x8x8xf32> to vector<2x8xf32>
    %27 = vector.shape_cast %26 : vector<2x8xf32> to vector<2x8x1xf32>
    %28 = vector.broadcast %27 : vector<2x8x1xf32> to vector<2x8x8xf32>
    %29 = arith.subf %25, %28 : vector<2x8x8xf32>
    %30 = math.exp %29 : vector<2x8x8xf32>
    %cst_14 = arith.constant dense<0.000000e+00> : vector<2x8xf32>
    %31 = vector.multi_reduction <add>, %30, %cst_14 [2] : vector<2x8x8xf32> to vector<2x8xf32>
    %32 = vector.shape_cast %31 : vector<2x8xf32> to vector<2x8x1xf32>
    %33 = vector.broadcast %32 : vector<2x8x1xf32> to vector<2x8x8xf32>
    %34 = arith.divf %30, %33 : vector<2x8x8xf32>
    %35 = arith.truncf %34 : vector<2x8x8xf32> to vector<2x8x8xbf16>
    "tpu.trace_start"() <{level = 10 : i32, message = "bqk,bkd->bqd"}> : () -> ()
    %cst_15 = arith.constant dense<0.000000e+00> : vector<2x8x8xf32>
    %36 = tpu.matmul %35, %21, %cst_15 {dimension_numbers = #tpu.dot_dimension_numbers<[2], [1], [1], [2], [0, 0, 0, 1, 1, 2], [0], [0]>} : vector<2x8x8xbf16>, vector<2x8x8xbf16>, vector<2x8x8xf32> -> vector<2x8x8xf32>
    "tpu.trace_stop"() : () -> ()
    %37 = vector.extract_strided_slice %15 {offsets = [0, 0, 8], sizes = [2, 8, 8], strides = [1, 1, 1]} : vector<2x8x96xf32> to vector<2x8x8xf32>
    %38 = arith.truncf %37 : vector<2x8x8xf32> to vector<2x8x8xbf16>
    %39 = vector.extract_strided_slice %15 {offsets = [0, 0, 40], sizes = [2, 8, 8], strides = [1, 1, 1]} : vector<2x8x96xf32> to vector<2x8x8xf32>
    %40 = arith.truncf %39 : vector<2x8x8xf32> to vector<2x8x8xbf16>
    %41 = vector.extract_strided_slice %15 {offsets = [0, 0, 72], sizes = [2, 8, 8], strides = [1, 1, 1]} : vector<2x8x96xf32> to vector<2x8x8xf32>
    %42 = arith.truncf %41 : vector<2x8x8xf32> to vector<2x8x8xbf16>
    "tpu.trace_start"() <{level = 10 : i32, message = "bqd,bkd->bqk"}> : () -> ()
    %cst_16 = arith.constant dense<0.000000e+00> : vector<2x8x8xf32>
    %43 = tpu.matmul %38, %40, %cst_16 {dimension_numbers = #tpu.dot_dimension_numbers<[2], [2], [1], [1], [0, 0, 0, 1, 1, 1], [0], [0]>} : vector<2x8x8xbf16>, vector<2x8x8xbf16>, vector<2x8x8xf32> -> vector<2x8x8xf32>
    "tpu.trace_stop"() : () -> ()
    %cst_17 = arith.constant 0.353553385 : f32
    %44 = vector.broadcast %cst_17 : f32 to vector<2x8x8xf32>
    %45 = arith.mulf %43, %44 : vector<2x8x8xf32>
    %46 = arith.addf %45, %6 : vector<2x8x8xf32>
    %cst_18 = arith.constant dense<0xFF800000> : vector<2x8xf32>
    %47 = vector.multi_reduction <maximumf>, %46, %cst_18 [2] : vector<2x8x8xf32> to vector<2x8xf32>
    %48 = vector.shape_cast %47 : vector<2x8xf32> to vector<2x8x1xf32>
    %49 = vector.broadcast %48 : vector<2x8x1xf32> to vector<2x8x8xf32>
    %50 = arith.subf %46, %49 : vector<2x8x8xf32>
    %51 = math.exp %50 : vector<2x8x8xf32>
    %cst_19 = arith.constant dense<0.000000e+00> : vector<2x8xf32>
    %52 = vector.multi_reduction <add>, %51, %cst_19 [2] : vector<2x8x8xf32> to vector<2x8xf32>
    %53 = vector.shape_cast %52 : vector<2x8xf32> to vector<2x8x1xf32>
    %54 = vector.broadcast %53 : vector<2x8x1xf32> to vector<2x8x8xf32>
    %55 = arith.divf %51, %54 : vector<2x8x8xf32>
    %56 = arith.truncf %55 : vector<2x8x8xf32> to vector<2x8x8xbf16>
    "tpu.trace_start"() <{level = 10 : i32, message = "bqk,bkd->bqd"}> : () -> ()
    %cst_20 = arith.constant dense<0.000000e+00> : vector<2x8x8xf32>
    %57 = tpu.matmul %56, %42, %cst_20 {dimension_numbers = #tpu.dot_dimension_numbers<[2], [1], [1], [2], [0, 0, 0, 1, 1, 2], [0], [0]>} : vector<2x8x8xbf16>, vector<2x8x8xbf16>, vector<2x8x8xf32> -> vector<2x8x8xf32>
    "tpu.trace_stop"() : () -> ()
    %58 = vector.extract_strided_slice %15 {offsets = [0, 0, 16], sizes = [2, 8, 8], strides = [1, 1, 1]} : vector<2x8x96xf32> to vector<2x8x8xf32>
    %59 = arith.truncf %58 : vector<2x8x8xf32> to vector<2x8x8xbf16>
    %60 = vector.extract_strided_slice %15 {offsets = [0, 0, 48], sizes = [2, 8, 8], strides = [1, 1, 1]} : vector<2x8x96xf32> to vector<2x8x8xf32>
    %61 = arith.truncf %60 : vector<2x8x8xf32> to vector<2x8x8xbf16>
    %62 = vector.extract_strided_slice %15 {offsets = [0, 0, 80], sizes = [2, 8, 8], strides = [1, 1, 1]} : vector<2x8x96xf32> to vector<2x8x8xf32>
    %63 = arith.truncf %62 : vector<2x8x8xf32> to vector<2x8x8xbf16>
    "tpu.trace_start"() <{level = 10 : i32, message = "bqd,bkd->bqk"}> : () -> ()
    %cst_21 = arith.constant dense<0.000000e+00> : vector<2x8x8xf32>
    %64 = tpu.matmul %59, %61, %cst_21 {dimension_numbers = #tpu.dot_dimension_numbers<[2], [2], [1], [1], [0, 0, 0, 1, 1, 1], [0], [0]>} : vector<2x8x8xbf16>, vector<2x8x8xbf16>, vector<2x8x8xf32> -> vector<2x8x8xf32>
    "tpu.trace_stop"() : () -> ()
    %cst_22 = arith.constant 0.353553385 : f32
    %65 = vector.broadcast %cst_22 : f32 to vector<2x8x8xf32>
    %66 = arith.mulf %64, %65 : vector<2x8x8xf32>
    %67 = arith.addf %66, %6 : vector<2x8x8xf32>
    %cst_23 = arith.constant dense<0xFF800000> : vector<2x8xf32>
    %68 = vector.multi_reduction <maximumf>, %67, %cst_23 [2] : vector<2x8x8xf32> to vector<2x8xf32>
    %69 = vector.shape_cast %68 : vector<2x8xf32> to vector<2x8x1xf32>
    %70 = vector.broadcast %69 : vector<2x8x1xf32> to vector<2x8x8xf32>
    %71 = arith.subf %67, %70 : vector<2x8x8xf32>
    %72 = math.exp %71 : vector<2x8x8xf32>
    %cst_24 = arith.constant dense<0.000000e+00> : vector<2x8xf32>
    %73 = vector.multi_reduction <add>, %72, %cst_24 [2] : vector<2x8x8xf32> to vector<2x8xf32>
    %74 = vector.shape_cast %73 : vector<2x8xf32> to vector<2x8x1xf32>
    %75 = vector.broadcast %74 : vector<2x8x1xf32> to vector<2x8x8xf32>
    %76 = arith.divf %72, %75 : vector<2x8x8xf32>
    %77 = arith.truncf %76 : vector<2x8x8xf32> to vector<2x8x8xbf16>
    "tpu.trace_start"() <{level = 10 : i32, message = "bqk,bkd->bqd"}> : () -> ()
    %cst_25 = arith.constant dense<0.000000e+00> : vector<2x8x8xf32>
    %78 = tpu.matmul %77, %63, %cst_25 {dimension_numbers = #tpu.dot_dimension_numbers<[2], [1], [1], [2], [0, 0, 0, 1, 1, 2], [0], [0]>} : vector<2x8x8xbf16>, vector<2x8x8xbf16>, vector<2x8x8xf32> -> vector<2x8x8xf32>
    "tpu.trace_stop"() : () -> ()
    %79 = vector.extract_strided_slice %15 {offsets = [0, 0, 24], sizes = [2, 8, 8], strides = [1, 1, 1]} : vector<2x8x96xf32> to vector<2x8x8xf32>
    %80 = arith.truncf %79 : vector<2x8x8xf32> to vector<2x8x8xbf16>
    %81 = vector.extract_strided_slice %15 {offsets = [0, 0, 56], sizes = [2, 8, 8], strides = [1, 1, 1]} : vector<2x8x96xf32> to vector<2x8x8xf32>
    %82 = arith.truncf %81 : vector<2x8x8xf32> to vector<2x8x8xbf16>
    %83 = vector.extract_strided_slice %15 {offsets = [0, 0, 88], sizes = [2, 8, 8], strides = [1, 1, 1]} : vector<2x8x96xf32> to vector<2x8x8xf32>
    %84 = arith.truncf %83 : vector<2x8x8xf32> to vector<2x8x8xbf16>
    "tpu.trace_start"() <{level = 10 : i32, message = "bqd,bkd->bqk"}> : () -> ()
    %cst_26 = arith.constant dense<0.000000e+00> : vector<2x8x8xf32>
    %85 = tpu.matmul %80, %82, %cst_26 {dimension_numbers = #tpu.dot_dimension_numbers<[2], [2], [1], [1], [0, 0, 0, 1, 1, 1], [0], [0]>} : vector<2x8x8xbf16>, vector<2x8x8xbf16>, vector<2x8x8xf32> -> vector<2x8x8xf32>
    "tpu.trace_stop"() : () -> ()
    %cst_27 = arith.constant 0.353553385 : f32
    %86 = vector.broadcast %cst_27 : f32 to vector<2x8x8xf32>
    %87 = arith.mulf %85, %86 : vector<2x8x8xf32>
    %88 = arith.addf %87, %6 : vector<2x8x8xf32>
    %cst_28 = arith.constant dense<0xFF800000> : vector<2x8xf32>
    %89 = vector.multi_reduction <maximumf>, %88, %cst_28 [2] : vector<2x8x8xf32> to vector<2x8xf32>
    %90 = vector.shape_cast %89 : vector<2x8xf32> to vector<2x8x1xf32>
    %91 = vector.broadcast %90 : vector<2x8x1xf32> to vector<2x8x8xf32>
    %92 = arith.subf %88, %91 : vector<2x8x8xf32>
    %93 = math.exp %92 : vector<2x8x8xf32>
    %cst_29 = arith.constant dense<0.000000e+00> : vector<2x8xf32>
    %94 = vector.multi_reduction <add>, %93, %cst_29 [2] : vector<2x8x8xf32> to vector<2x8xf32>
    %95 = vector.shape_cast %94 : vector<2x8xf32> to vector<2x8x1xf32>
    %96 = vector.broadcast %95 : vector<2x8x1xf32> to vector<2x8x8xf32>
    %97 = arith.divf %93, %96 : vector<2x8x8xf32>
    %98 = arith.truncf %97 : vector<2x8x8xf32> to vector<2x8x8xbf16>
    "tpu.trace_start"() <{level = 10 : i32, message = "bqk,bkd->bqd"}> : () -> ()
    %cst_30 = arith.constant dense<0.000000e+00> : vector<2x8x8xf32>
    %99 = tpu.matmul %98, %84, %cst_30 {dimension_numbers = #tpu.dot_dimension_numbers<[2], [1], [1], [2], [0, 0, 0, 1, 1, 2], [0], [0]>} : vector<2x8x8xbf16>, vector<2x8x8xbf16>, vector<2x8x8xf32> -> vector<2x8x8xf32>
    "tpu.trace_stop"() : () -> ()
    %100 = tpu.concatenate %36, %57, %78, %99 in 2 : vector<2x8x8xf32>, vector<2x8x8xf32>, vector<2x8x8xf32>, vector<2x8x8xf32> -> vector<2x8x32xf32>
    %101 = vector.shape_cast %100 : vector<2x8x32xf32> to vector<16x32xf32>
    %102 = arith.truncf %101 : vector<16x32xf32> to vector<16x32xbf16>
    %c0_31 = arith.constant 0 : index
    %c0_32 = arith.constant 0 : index
    %c0_33 = arith.constant 0 : index
    %103 = vector.load %arg8[%c0_31, %c0_32, %c0_33] : memref<1x32x32xbf16, #tpu.memory_space<vmem>>, vector<1x32x32xbf16>
    %104 = vector.shape_cast %103 : vector<1x32x32xbf16> to vector<32x32xbf16>
    %cst_34 = arith.constant dense<0.000000e+00> : vector<16x32xf32>
    %105 = tpu.matmul %102, %104, %cst_34 {dimension_numbers = #tpu.dot_dimension_numbers<[1], [0], [0], [1], [0, 0, 1, 1], [], []>} : vector<16x32xbf16>, vector<32x32xbf16>, vector<16x32xf32> -> vector<16x32xf32>
    %c0_35 = arith.constant 0 : index
    %c0_36 = arith.constant 0 : index
    %c0_37 = arith.constant 0 : index
    %106 = vector.load %arg9[%c0_35, %c0_36, %c0_37] : memref<1x1x32xf32, #tpu.memory_space<vmem>>, vector<1x1x32xf32>
    %107 = vector.shape_cast %106 : vector<1x1x32xf32> to vector<1x32xf32>
    %108 = vector.broadcast %107 : vector<1x32xf32> to vector<16x32xf32>
    %109 = arith.addf %105, %108 : vector<16x32xf32>
    %110 = arith.addf %109, %3 : vector<16x32xf32>
    %c0_38 = arith.constant 0 : index
    %c0_39 = arith.constant 0 : index
    %c0_40 = arith.constant 0 : index
    %111 = vector.load %arg10[%c0_38, %c0_39, %c0_40] : memref<1x1x32xf32, #tpu.memory_space<vmem>>, vector<1x1x32xf32>
    %112 = vector.shape_cast %111 : vector<1x1x32xf32> to vector<1x32xf32>
    %c0_41 = arith.constant 0 : index
    %c0_42 = arith.constant 0 : index
    %c0_43 = arith.constant 0 : index
    %113 = vector.load %arg11[%c0_41, %c0_42, %c0_43] : memref<1x1x32xf32, #tpu.memory_space<vmem>>, vector<1x1x32xf32>
    %114 = vector.shape_cast %113 : vector<1x1x32xf32> to vector<1x32xf32>
    %cst_44 = arith.constant dense<0.000000e+00> : vector<16xf32>
    %115 = vector.multi_reduction <add>, %110, %cst_44 [1] : vector<16x32xf32> to vector<16xf32>
    %116 = vector.shape_cast %115 : vector<16xf32> to vector<16x1xf32>
    %cst_45 = arith.constant 3.200000e+01 : f32
    %117 = vector.broadcast %cst_45 : f32 to vector<16x1xf32>
    %118 = arith.divf %116, %117 : vector<16x1xf32>
    %119 = vector.broadcast %118 : vector<16x1xf32> to vector<16x32xf32>
    %120 = arith.subf %110, %119 : vector<16x32xf32>
    %121 = arith.mulf %120, %120 : vector<16x32xf32>
    %cst_46 = arith.constant dense<0.000000e+00> : vector<16xf32>
    %122 = vector.multi_reduction <add>, %121, %cst_46 [1] : vector<16x32xf32> to vector<16xf32>
    %123 = vector.shape_cast %122 : vector<16xf32> to vector<16x1xf32>
    %cst_47 = arith.constant 3.200000e+01 : f32
    %124 = vector.broadcast %cst_47 : f32 to vector<16x1xf32>
    %125 = arith.divf %123, %124 : vector<16x1xf32>
    %cst_48 = arith.constant 9.99999974E-6 : f32
    %126 = vector.broadcast %cst_48 : f32 to vector<16x1xf32>
    %127 = arith.addf %125, %126 : vector<16x1xf32>
    %128 = math.rsqrt %127 : vector<16x1xf32>
    %129 = vector.broadcast %128 : vector<16x1xf32> to vector<16x32xf32>
    %130 = arith.mulf %120, %129 : vector<16x32xf32>
    %131 = vector.broadcast %112 : vector<1x32xf32> to vector<16x32xf32>
    %132 = arith.mulf %130, %131 : vector<16x32xf32>
    %133 = vector.broadcast %114 : vector<1x32xf32> to vector<16x32xf32>
    %134 = arith.addf %132, %133 : vector<16x32xf32>
    %135 = arith.truncf %134 : vector<16x32xf32> to vector<16x32xbf16>
    %c0_49 = arith.constant 0 : index
    %c0_50 = arith.constant 0 : index
    %c0_51 = arith.constant 0 : index
    %136 = vector.load %arg12[%c0_49, %c0_50, %c0_51] : memref<1x32x64xbf16, #tpu.memory_space<vmem>>, vector<1x32x64xbf16>
    %137 = vector.shape_cast %136 : vector<1x32x64xbf16> to vector<32x64xbf16>
    %cst_52 = arith.constant dense<0.000000e+00> : vector<16x64xf32>
    %138 = tpu.matmul %135, %137, %cst_52 {dimension_numbers = #tpu.dot_dimension_numbers<[1], [0], [0], [1], [0, 0, 1, 1], [], []>} : vector<16x32xbf16>, vector<32x64xbf16>, vector<16x64xf32> -> vector<16x64xf32>
    %c0_53 = arith.constant 0 : index
    %c0_54 = arith.constant 0 : index
    %c0_55 = arith.constant 0 : index
    %139 = vector.load %arg13[%c0_53, %c0_54, %c0_55] : memref<1x1x64xf32, #tpu.memory_space<vmem>>, vector<1x1x64xf32>
    %140 = vector.shape_cast %139 : vector<1x1x64xf32> to vector<1x64xf32>
    %141 = vector.broadcast %140 : vector<1x64xf32> to vector<16x64xf32>
    %142 = arith.addf %138, %141 : vector<16x64xf32>
    %cst_56 = arith.constant 0.707106769 : f32
    %143 = vector.broadcast %cst_56 : f32 to vector<16x64xf32>
    %144 = arith.mulf %142, %143 : vector<16x64xf32>
    %145 = math.absf %144 : vector<16x64xf32>
    %cst_57 = arith.constant 0.327591091 : f32
    %146 = vector.broadcast %cst_57 : f32 to vector<16x64xf32>
    %147 = arith.mulf %146, %145 : vector<16x64xf32>
    %cst_58 = arith.constant 1.000000e+00 : f32
    %148 = vector.broadcast %cst_58 : f32 to vector<16x64xf32>
    %149 = arith.addf %148, %147 : vector<16x64xf32>
    %cst_59 = arith.constant 1.000000e+00 : f32
    %150 = vector.broadcast %cst_59 : f32 to vector<16x64xf32>
    %151 = arith.divf %150, %149 : vector<16x64xf32>
    %cst_60 = arith.constant 1.06140542 : f32
    %152 = vector.broadcast %cst_60 : f32 to vector<16x64xf32>
    %153 = arith.mulf %152, %151 : vector<16x64xf32>
    %cst_61 = arith.constant 1.45315206 : f32
    %154 = vector.broadcast %cst_61 : f32 to vector<16x64xf32>
    %155 = arith.subf %153, %154 : vector<16x64xf32>
    %156 = arith.mulf %155, %151 : vector<16x64xf32>
    %cst_62 = arith.constant 1.42141378 : f32
    %157 = vector.broadcast %cst_62 : f32 to vector<16x64xf32>
    %158 = arith.addf %156, %157 : vector<16x64xf32>
    %159 = arith.mulf %158, %151 : vector<16x64xf32>
    %cst_63 = arith.constant 0.284496725 : f32
    %160 = vector.broadcast %cst_63 : f32 to vector<16x64xf32>
    %161 = arith.subf %159, %160 : vector<16x64xf32>
    %162 = arith.mulf %161, %151 : vector<16x64xf32>
    %cst_64 = arith.constant 0.254829586 : f32
    %163 = vector.broadcast %cst_64 : f32 to vector<16x64xf32>
    %164 = arith.addf %162, %163 : vector<16x64xf32>
    %165 = arith.mulf %164, %151 : vector<16x64xf32>
    %cst_65 = arith.constant 0.000000e+00 : f32
    %166 = vector.broadcast %cst_65 : f32 to vector<16x64xf32>
    %167 = arith.subf %166, %145 : vector<16x64xf32>
    %168 = arith.mulf %167, %145 : vector<16x64xf32>
    %169 = math.exp %168 : vector<16x64xf32>
    %170 = arith.mulf %165, %169 : vector<16x64xf32>
    %cst_66 = arith.constant 1.000000e+00 : f32
    %171 = vector.broadcast %cst_66 : f32 to vector<16x64xf32>
    %172 = arith.subf %171, %170 : vector<16x64xf32>
    %cst_67 = arith.constant 0.000000e+00 : f32
    %173 = vector.broadcast %cst_67 : f32 to vector<16x64xf32>
    %174 = arith.cmpf oge, %144, %173 : vector<16x64xf32>
    %cst_68 = arith.constant 0.000000e+00 : f32
    %175 = vector.broadcast %cst_68 : f32 to vector<16x64xf32>
    %176 = arith.subf %175, %172 : vector<16x64xf32>
    %177 = arith.select %174, %172, %176 : vector<16x64xi1>, vector<16x64xf32>
    %cst_69 = arith.constant 5.000000e-01 : f32
    %178 = vector.broadcast %cst_69 : f32 to vector<16x64xf32>
    %179 = arith.mulf %178, %142 : vector<16x64xf32>
    %cst_70 = arith.constant 1.000000e+00 : f32
    %180 = vector.broadcast %cst_70 : f32 to vector<16x64xf32>
    %181 = arith.addf %180, %177 : vector<16x64xf32>
    %182 = arith.mulf %179, %181 : vector<16x64xf32>
    %183 = arith.truncf %182 : vector<16x64xf32> to vector<16x64xbf16>
    %c0_71 = arith.constant 0 : index
    %c0_72 = arith.constant 0 : index
    %c0_73 = arith.constant 0 : index
    %184 = vector.load %arg14[%c0_71, %c0_72, %c0_73] : memref<1x64x32xbf16, #tpu.memory_space<vmem>>, vector<1x64x32xbf16>
    %185 = vector.shape_cast %184 : vector<1x64x32xbf16> to vector<64x32xbf16>
    %cst_74 = arith.constant dense<0.000000e+00> : vector<16x32xf32>
    %186 = tpu.matmul %183, %185, %cst_74 {dimension_numbers = #tpu.dot_dimension_numbers<[1], [0], [0], [1], [0, 0, 1, 1], [], []>} : vector<16x64xbf16>, vector<64x32xbf16>, vector<16x32xf32> -> vector<16x32xf32>
    %c0_75 = arith.constant 0 : index
    %c0_76 = arith.constant 0 : index
    %c0_77 = arith.constant 0 : index
    %187 = vector.load %arg15[%c0_75, %c0_76, %c0_77] : memref<1x1x32xf32, #tpu.memory_space<vmem>>, vector<1x1x32xf32>
    %188 = vector.shape_cast %187 : vector<1x1x32xf32> to vector<1x32xf32>
    %189 = vector.broadcast %188 : vector<1x32xf32> to vector<16x32xf32>
    %190 = arith.addf %186, %189 : vector<16x32xf32>
    %191 = arith.addf %190, %134 : vector<16x32xf32>
    %c0_78 = arith.constant 0 : index
    %c0_79 = arith.constant 0 : index
    %c0_80 = arith.constant 0 : index
    %192 = vector.load %arg16[%c0_78, %c0_79, %c0_80] : memref<1x1x32xf32, #tpu.memory_space<vmem>>, vector<1x1x32xf32>
    %193 = vector.shape_cast %192 : vector<1x1x32xf32> to vector<1x32xf32>
    %c0_81 = arith.constant 0 : index
    %c0_82 = arith.constant 0 : index
    %c0_83 = arith.constant 0 : index
    %194 = vector.load %arg17[%c0_81, %c0_82, %c0_83] : memref<1x1x32xf32, #tpu.memory_space<vmem>>, vector<1x1x32xf32>
    %195 = vector.shape_cast %194 : vector<1x1x32xf32> to vector<1x32xf32>
    %cst_84 = arith.constant dense<0.000000e+00> : vector<16xf32>
    %196 = vector.multi_reduction <add>, %191, %cst_84 [1] : vector<16x32xf32> to vector<16xf32>
    %197 = vector.shape_cast %196 : vector<16xf32> to vector<16x1xf32>
    %cst_85 = arith.constant 3.200000e+01 : f32
    %198 = vector.broadcast %cst_85 : f32 to vector<16x1xf32>
    %199 = arith.divf %197, %198 : vector<16x1xf32>
    %200 = vector.broadcast %199 : vector<16x1xf32> to vector<16x32xf32>
    %201 = arith.subf %191, %200 : vector<16x32xf32>
    %202 = arith.mulf %201, %201 : vector<16x32xf32>
    %cst_86 = arith.constant dense<0.000000e+00> : vector<16xf32>
    %203 = vector.multi_reduction <add>, %202, %cst_86 [1] : vector<16x32xf32> to vector<16xf32>
    %204 = vector.shape_cast %203 : vector<16xf32> to vector<16x1xf32>
    %cst_87 = arith.constant 3.200000e+01 : f32
    %205 = vector.broadcast %cst_87 : f32 to vector<16x1xf32>
    %206 = arith.divf %204, %205 : vector<16x1xf32>
    %cst_88 = arith.constant 9.99999974E-6 : f32
    %207 = vector.broadcast %cst_88 : f32 to vector<16x1xf32>
    %208 = arith.addf %206, %207 : vector<16x1xf32>
    %209 = math.rsqrt %208 : vector<16x1xf32>
    %210 = vector.broadcast %209 : vector<16x1xf32> to vector<16x32xf32>
    %211 = arith.mulf %201, %210 : vector<16x32xf32>
    %212 = vector.broadcast %193 : vector<1x32xf32> to vector<16x32xf32>
    %213 = arith.mulf %211, %212 : vector<16x32xf32>
    %214 = vector.broadcast %195 : vector<1x32xf32> to vector<16x32xf32>
    %215 = arith.addf %213, %214 : vector<16x32xf32>
    %c0_89 = arith.constant 0 : index
    %c0_90 = arith.constant 0 : index
    %216 = vector.load %arg19[%c0_89, %c0_90] : memref<16x32xf32, #tpu.memory_space<vmem>>, vector<16x32xf32>
    tpu.vector_store %arg19[%c0_89, %c0_90], %215 {strides = array<i32>} : memref<16x32xf32, #tpu.memory_space<vmem>>, vector<16x32xf32>,
    %c1_i32 = arith.constant 1 : i32
    %217 = arith.cmpi eq, %arg1, %c1_i32 : i32
    %218 = arith.extui %217 : i1 to i32
    %c0_i32_91 = arith.constant 0 : i32
    %219 = arith.cmpi ne, %218, %c0_i32_91 : i32
    scf.if %219 {
      %220 = vector.shape_cast %215 : vector<16x32xf32> to vector<2x8x32xf32>
      %221 = vector.extract_strided_slice %220 {offsets = [0, 0, 0], sizes = [2, 1, 32], strides = [1, 1, 1]} : vector<2x8x32xf32> to vector<2x1x32xf32>
      %c0_92 = arith.constant 0 : index
      %c0_93 = arith.constant 0 : index
      %c0_94 = arith.constant 0 : index
      %222 = vector.load %arg18[%c0_92, %c0_93, %c0_94] : memref<2x1x32xf32, #tpu.memory_space<vmem>>, vector<2x1x32xf32>
      tpu.vector_store %arg18[%c0_92, %c0_93, %c0_94], %221 {strides = array<i32>} : memref<2x1x32xf32, #tpu.memory_space<vmem>>, vector<2x1x32xf32>,
    } else {
    }
    return
  }
  func.func @transform_0(%arg0: i32, %arg1: i32) -> (i32, i32) {
    %c0_i32 = arith.constant 0 : i32
    %c0_i32_0 = arith.constant 0 : i32
    return %arg0, %c0_i32 : i32, i32
  }
  func.func @transform_1(%arg0: i32, %arg1: i32) -> (i32, i32, i32) {
    %c0_i32 = arith.constant 0 : i32
    %c0_i32_0 = arith.constant 0 : i32
    %c0_i32_1 = arith.constant 0 : i32
    return %arg0, %c0_i32, %c0_i32_0 : i32, i32, i32
  }
  func.func @transform_2(%arg0: i32, %arg1: i32) -> (i32, i32) {
    %c0_i32 = arith.constant 0 : i32
    %c0_i32_0 = arith.constant 0 : i32
    %c0_i32_1 = arith.constant 0 : i32
    return %c0_i32, %c0_i32_0 : i32, i32
  }
  func.func @transform_3(%arg0: i32, %arg1: i32) -> (i32, i32) {
    %c0_i32 = arith.constant 0 : i32
    %c0_i32_0 = arith.constant 0 : i32
    %c0_i32_1 = arith.constant 0 : i32
    return %c0_i32, %c0_i32_0 : i32, i32
  }
  func.func @transform_4(%arg0: i32, %arg1: i32) -> (i32, i32, i32) {
    %c0_i32 = arith.constant 0 : i32
    %c0_i32_0 = arith.constant 0 : i32
    %c0_i32_1 = arith.constant 0 : i32
    return %arg1, %c0_i32, %c0_i32_0 : i32, i32, i32
  }
  func.func @transform_5(%arg0: i32, %arg1: i32) -> (i32, i32, i32) {
    %c0_i32 = arith.constant 0 : i32
    %c0_i32_0 = arith.constant 0 : i32
    %c0_i32_1 = arith.constant 0 : i32
    return %arg1, %c0_i32, %c0_i32_0 : i32, i32, i32
  }
  func.func @transform_6(%arg0: i32, %arg1: i32) -> (i32, i32, i32) {
    %c0_i32 = arith.constant 0 : i32
    %c0_i32_0 = arith.constant 0 : i32
    %c0_i32_1 = arith.constant 0 : i32
    return %arg1, %c0_i32, %c0_i32_0 : i32, i32, i32
  }
  func.func @transform_7(%arg0: i32, %arg1: i32) -> (i32, i32, i32) {
    %c0_i32 = arith.constant 0 : i32
    %c0_i32_0 = arith.constant 0 : i32
    %c0_i32_1 = arith.constant 0 : i32
    return %arg1, %c0_i32, %c0_i32_0 : i32, i32, i32
  }
  func.func @transform_8(%arg0: i32, %arg1: i32) -> (i32, i32, i32) {
    %c0_i32 = arith.constant 0 : i32
    %c0_i32_0 = arith.constant 0 : i32
    %c0_i32_1 = arith.constant 0 : i32
    return %arg1, %c0_i32, %c0_i32_0 : i32, i32, i32
  }
  func.func @transform_9(%arg0: i32, %arg1: i32) -> (i32, i32, i32) {
    %c0_i32 = arith.constant 0 : i32
    %c0_i32_0 = arith.constant 0 : i32
    %c0_i32_1 = arith.constant 0 : i32
    return %arg1, %c0_i32, %c0_i32_0 : i32, i32, i32
  }
  func.func @transform_10(%arg0: i32, %arg1: i32) -> (i32, i32, i32) {
    %c0_i32 = arith.constant 0 : i32
    %c0_i32_0 = arith.constant 0 : i32
    %c0_i32_1 = arith.constant 0 : i32
    return %arg1, %c0_i32, %c0_i32_0 : i32, i32, i32
  }
  func.func @transform_11(%arg0: i32, %arg1: i32) -> (i32, i32, i32) {
    %c0_i32 = arith.constant 0 : i32
    %c0_i32_0 = arith.constant 0 : i32
    %c0_i32_1 = arith.constant 0 : i32
    return %arg1, %c0_i32, %c0_i32_0 : i32, i32, i32
  }
  func.func @transform_12(%arg0: i32, %arg1: i32) -> (i32, i32, i32) {
    %c0_i32 = arith.constant 0 : i32
    %c0_i32_0 = arith.constant 0 : i32
    %c0_i32_1 = arith.constant 0 : i32
    return %arg1, %c0_i32, %c0_i32_0 : i32, i32, i32
  }
  func.func @transform_13(%arg0: i32, %arg1: i32) -> (i32, i32, i32) {
    %c0_i32 = arith.constant 0 : i32
    %c0_i32_0 = arith.constant 0 : i32
    %c0_i32_1 = arith.constant 0 : i32
    return %arg1, %c0_i32, %c0_i32_0 : i32, i32, i32
  }
  func.func @transform_14(%arg0: i32, %arg1: i32) -> (i32, i32, i32) {
    %c0_i32 = arith.constant 0 : i32
    %c0_i32_0 = arith.constant 0 : i32
    %c0_i32_1 = arith.constant 0 : i32
    return %arg1, %c0_i32, %c0_i32_0 : i32, i32, i32
  }
  func.func @transform_15(%arg0: i32, %arg1: i32) -> (i32, i32, i32) {
    %c0_i32 = arith.constant 0 : i32
    %c0_i32_0 = arith.constant 0 : i32
    %c0_i32_1 = arith.constant 0 : i32
    return %arg1, %c0_i32, %c0_i32_0 : i32, i32, i32
  }
  func.func @transform_16(%arg0: i32, %arg1: i32) -> (i32, i32, i32) {
    %c0_i32 = arith.constant 0 : i32
    %c0_i32_0 = arith.constant 0 : i32
    %c0_i32_1 = arith.constant 0 : i32
    return %arg0, %c0_i32, %c0_i32_0 : i32, i32, i32
  }
}

</mosaic_0001>

<bundles_post_ra>
// kernel: text_cls_forward.1
= control target key start
LH: loop header
LB: loop body
LE: loop exit
PB: predicated region body
PF: predicated region fallthrough
CT: control target
= control target key end

     0   :  { %s5168_s0 = inlined_call_operand.hbm [shape: f32[32,32], index: 0, kind: input, shape index: {}]   ;;  %s5169_s1 = inlined_call_operand.hbm [shape: f32[4,1,8], index: 1, kind: input, shape index: {}]   ;;  %s5170_s2 = inlined_call_operand.hbm [shape: f32[1,32], index: 2, kind: input, shape index: {}]   ;;  %s5171_s3 = inlined_call_operand.hbm [shape: f32[1,32], index: 3, kind: input, shape index: {}]   ;;  %s5172_s4 = inlined_call_operand.hbm [shape: bf16[2,32,96], index: 4, kind: input, shape index: {}]   ;;  %s5173_s5 = inlined_call_operand.hbm [shape: f32[2,1,96], index: 5, kind: input, shape index: {}]   ;;  %s5174_s6 = inlined_call_operand.hbm [shape: bf16[2,32,32], index: 6, kind: input, shape index: {}]   ;;  %s5175_s7 = inlined_call_operand.hbm [shape: f32[2,1,32], index: 7, kind: input, shape index: {}]   ;;  %s5176_s8 = inlined_call_operand.hbm [shape: f32[2,1,32], index: 8, kind: input, shape index: {}]   ;;  %s5177_s9 = inlined_call_operand.hbm [shape: f32[2,1,32], index: 9, kind: input, shape index: {}]   ;;  %s5178_s10 = inlined_call_operand.hbm [shape: bf16[2,32,64], index: 10, kind: input, shape index: {}]   ;;  %s5179_s11 = inlined_call_operand.hbm [shape: f32[2,1,64], index: 11, kind: input, shape index: {}]   ;;  %s5180_s12 = inlined_call_operand.hbm [shape: bf16[2,64,32], index: 12, kind: input, shape index: {}]   ;;  %s5181_s13 = inlined_call_operand.hbm [shape: f32[2,1,32], index: 13, kind: input, shape index: {}]   ;;  %s5182_s14 = inlined_call_operand.hbm [shape: f32[2,1,32], index: 14, kind: input, shape index: {}]   ;;  %s5183_s15 = inlined_call_operand.hbm [shape: f32[2,1,32], index: 15, kind: input, shape index: {}]   ;;  %s5184_s16 = inlined_call_operand.hbm [shape: f32[4,1,32], index: 16, kind: output, shape index: {}]  }
   0x1   :  { %5225 = sst [smem:[#allocation56_spill]] %s5168_s0 }
   0x2   :  { %5226 = sst [smem:[#allocation57_spill]] %s5169_s1 }
   0x3   :  { %5227 = sst [smem:[#allocation58_spill]] %s5170_s2 }
   0x4   :  { %5228 = sst [smem:[#allocation59_spill]] %s5171_s3 }
   0x5   :  { %5229 = sst [smem:[#allocation60_spill]] %s5172_s4 }
   0x6   :  { %5230 = sst [smem:[#allocation61_spill]] %s5173_s5 }
   0x7   :  { %5231 = sst [smem:[#allocation62_spill]] %s5174_s6 }
   0x8   :  { %5232 = sst [smem:[#allocation63_spill]] %s5175_s7 }
   0x9   :  { %5233 = sst [smem:[#allocation64_spill]] %s5178_s10 }
   0xa   :  { %5234 = sst [smem:[#allocation65_spill]] %s5179_s11 }
   0xb   :  { %5235 = sst [smem:[#allocation66_spill]] %s5180_s12 }
   0xc   :  { %5236 = sst [smem:[#allocation67_spill]] %s5181_s13 }
   0xd   :  { %5237 = sst [smem:[#allocation68_spill]] %s5182_s14 }
   0xe   :  { %5238 = sst [smem:[#allocation69_spill]] %s5183_s15 }
   0xf   :  { %5239 = sst [smem:[#allocation70_spill]] %s5184_s16 }
  0x10   :  { %21 = vsyncpa [#allocation4], 0 }
  0x11   :  { %23 = vsyncpa [#allocation4 + $0x1], 0 }
  0x12   :  { %24 = vsyncpa [#allocation7], 0 }
  0x13   :  { %26 = vsyncpa [#allocation7 + $0x1], 0 }
  0x14   :  { %27 = vsyncpa [#allocation10], 0 }
  0x15   :  { %28 = vsyncpa [#allocation5], 0 }
  0x16   :  { %30 = vsyncpa [#allocation5 + $0x1], 0  ;;  %s4100_s21 = smov 0   ;;  %s4102_s22 = smov 0  }
  0x17   :  { %s4104_s23 = smov 0   ;;  %s4106_s24 = smov 0  }
  0x18   :  { %s4108_s25 = smov 0   ;;  %s4110_s26 = smov 0  }
  0x19   :  { %s4112_s27 = smov 0   ;;  %s4114_s28 = smov 0  }
  0x1a   :  { %s4116_s29 = smov 0   ;;  %s4118_s30 = smov 0  }
  0x1b   :  { %s4120_s0 = smov 0  }
  0x1c LB: > { %5240 = sst [smem:[#allocation41_spill]] %s3937_s22  ;;  %s4156_s17 = sadd.s32 4294967295, %s3973_s0   ;;  %s3973_s0 = sphi %s4120_s0, %s36_s0   ;;  %s3969_s30 = sphi %s4118_s30, %s5320_s30   ;;  %s3965_s29 = sphi %s4116_s29, %s5319_s29   ;;  %s3961_s28 = sphi %s4114_s28, %s5313_s28   ;;  %s3957_s27 = sphi %s4112_s27, %s5318_s27   ;;  %s3953_s26 = sphi %s4110_s26, %s5312_s26   ;;  %s3949_s25 = sphi %s4108_s25, %s5311_s25   ;;  %s3945_s24 = sphi %s4106_s24, %s5310_s24   ;;  %s3941_s23 = sphi %s4104_s23, %s5317_s23   ;;  %s3937_s22 = sphi %s4102_s22, %s5316_s22   ;;  %s3933_s21 = sphi %s4100_s21, %s5308_s21  }
  0x1d   : > { %5241 = sst [smem:[#allocation42_spill]] %s3945_s24  ;;  %s2820_s18 = sadd.s32 4294967294, %s3973_s0  }
  0x1e   : > { %5242 = sst [smem:[#allocation43_spill]] %s3949_s25  ;;  %s45_s19 = sadd.s32 1, %s3965_s29 }
  0x1f   : > { %5243 = sst [smem:[#allocation44_spill]] %s3953_s26  ;;  %s48_s20 = sadd.s32 1, %s3969_s30 }
  0x20   : > { %5244 = sst [smem:[#allocation45_spill]] %s3957_s27  ;;  %p46_p0 = scmp.ge.s32.totalorder %s45_s19, 2 }
  0x21   : > { %5245 = sst [smem:[#allocation46_spill]] %s3961_s28  ;;  %s55_s16 = sadd.s32 1, %s3953_s26 }
  0x22   : > { %5246 = sst [smem:[#allocation47_spill]] %s3969_s30  ;;  %p5195_p1 = scmp.ne.s32.totalorder %s3953_s26, %s3949_s25 }
  0x23   : > { %p63_p2 = scmp.eq.s32.totalorder %s3973_s0, 0  ;;  %s5322_s19 = smov (%p46_p0, %s45_s19), 0 }
  0x24   : > { %5247 = sst [smem:[#allocation48_spill]] %s5322_s19  ;;  %s5324_s20 = smov (!%p46_p0, %s48_s20), %s3969_s30 }
  0x25   : > { %p4173_p3 = por %p63_p2, %p5195_p1  ;;  %p5194_p4 = scmp.ne.s32.totalorder %s3949_s25, %s3945_s24 }
  0x26   : > { %p50_p5 = scmp.ge.s32.totalorder %s5324_s20, 2  ;;  %p5206_p6 = scmp.eq.s32.totalorder %s4156_s17, 0 }
  0x27   : > { %s5248_s28 = scalar_select %p4173_p3, 1, 0 }
  0x28   : > { %s146_s27 = ssub.s32 %s3965_s29, %s5322_s19  ;;  %s149_s15 = sadd.s32 1, %s3941_s23 }
  0x29   : > { %s5326_s20 = smov (%p50_p5, %s5324_s20), 0  ;;  %p4190_p7 = por %p5206_p6, %p5194_p4 }
  0x2a   : > { %5249 = sst [smem:[#allocation49_spill]] %s5326_s20  ;;  %p147_p8 = scmp.eq.s32.totalorder %s146_s27, 0 }
  0x2b   : > { %s5250_s14 = scalar_select %p4190_p7, 1, 0 }
  0x2c   : > { %s52_s13 = ssub.s32 %s3969_s30, %s5326_s20  ;;  %p156_p9 = scmp.ne.s32.totalorder %s3941_s23, %s3937_s22 }
  0x2d   : > { %5251 = sst [smem:[#allocation50_spill]] %s5250_s14  ;;  %p53_p10 = scmp.eq.s32.totalorder %s52_s13, 0 }
  0x2e   : > { %p162_p11 = scmp.ne.s32.totalorder %s3937_s22, %s3933_s21  ;;  %p4208_p12 = por %p156_p9, %p63_p2 }
  0x2f   : > { %s4201_s19 = scalar_select %p147_p8, %s3941_s23, %s149_s15  }
  0x30   : > { %s4204_s12 = scalar_select %p53_p10, %s3953_s26, %s55_s16  }
  0x31   : > { %5252 = sst [smem:[#allocation51_spill]] %s4201_s19  ;;  %p4214_p13 = por %p162_p11, %p5206_p6 }
  0x32   : > { %5253 = sst [smem:[#allocation52_spill]] %s4204_s12  ;;  %p472_p0 = scmp.eq.s32.totalorder %s4156_s17, 3 }
  0x33   : > { %s5254_s11 = scalar_select %p4208_p12, 1, 0 }
  0x34   : > { %s5255_s10 = scalar_select %p4214_p13, 1, 0 }
  0x35   : > { %p478_p5 = scmp.eq.s32.totalorder %s2820_s18, 3  ;;  %p2821_p4 = scmp.ge.s32.totalorder %s3973_s0, 1 }
  0x36   : > { %5256 = sst [smem:[#allocation53_spill]] %s5255_s10  ;;  %p485_p1 = scmp.lt.s32.totalorder %s3973_s0, 5 }
  0x37   : > { %p5257_p7 = scmp.ne.s32.totalorder %s3953_s26, %s3949_s25  ;;  %p5260_p10 = scmp.ne.s32.totalorder %s3949_s25, %s3945_s24 }
  0x38   : > { %p4235_p2 = pnand %p2821_p4, %p485_p1  ;;  %s3975_s21 = smov [#allocation8]  }
  0x39   : > { %p4224_p8 = por %p472_p0, %p5257_p7  ;;  %p4231_p3 = por %p478_p5, %p5260_p10 }
  0x3a   : > { %s5263_s16 = scalar_select %p4235_p2, 1, 0 }
  0x3b   : > { %s5258_s13 = scalar_select %p4224_p8, 1, 0 }
  0x3c   : > { %s5261_s15 = scalar_select %p4231_p3, 1, 0 }
  0x3d   : > { %5259 = sst [smem:[#allocation54_spill]] %s5258_s13  ;;  %p3137_p9 = pneg %p4235_p2 }
  0x3e   : > { %5262 = sst [smem:[#allocation55_spill]] %s5261_s15  ;;  %s498_s27 = sshll.u32 %s3975_s21, 4  ;;  %s499_s27 = int_to_ptr.vmem [resolvable:$true] %s498_s27 }
  0x3f   : > { %s3976_s18 = smov [#allocation9]   ;;  %p4243_p7 = pnand %p3137_p9, %p5206_p6 }
  0x40   : > { %s509_s20 = sshll.u32 %s3976_s18, 4  ;;  %s5265_s2 = sld [smem:[#allocation58_spill]]  ;;  %s4247_s20 = int_to_ptr.vmem [resolvable:$true] %s509_s20 }
  0x41   : > { %p3345_p4 = pneg %p4243_p7 }
  0x46   : > { %s3343_s24 = scalar_lea.hbm %s5265_s2, 16 }
  0x47   : > { %p3344_p1 = scmp.ne.s32.totalorder %s5265_s2, %s3343_s24  ;;  %p3350_p5 = scmp.lt.u32.totalorder %s3343_s24, %s5265_s2 }
  0x49   : > { %p3346_p11 = pnand %p3345_p4, %p3344_p1 }
  0x4b   : > { %p3347_p0 = pneg %p3346_p11 }
  0x4d   : > { %p3352_p10 = pnand %p3350_p5, %p3347_p0 }
  0x4f   : > { %3355 = shalt.err (!%p3352_p10)
}
  0x50   : > { %s3356_s22 = scalar_lea.vmem %s499_s27, 16  ;;  %s3363_s10 = scalar_lea.vmem %s499_s27, 32 }
  0x51   : > { %p3357_p9 = scmp.ne.s32.totalorder %s499_s27, %s3356_s22  ;;  %p3364_p8 = scmp.lt.s32.totalorder %s499_s27, %s499_s27 }
  0x52   : > { %p3365_p13 = scmp.lt.s32.totalorder %s3363_s10, %s3356_s22 }
  0x53   : > { %p3359_p6 = pnand %p3357_p9, %p3345_p4 }
  0x54   : > { %p3366_p2 = por %p3365_p13, %p3364_p8 }
  0x55   : > { %p3360_p3 = pneg %p3359_p6 }
  0x57   : > { %p3367_p12 = pnand %p3366_p2, %p3360_p3 }
  0x59   : > { %3370 = shalt.err (!%p3367_p12)
}
  0x5a   : > { %3140 = dma.hbm_to_vmem [thread:$0]  (!%p4243_p7), %s5265_s2, 16, %s499_s27, [#allocation7]  }
  0x5b   : > { %s5266_s3 = sld [smem:[#allocation59_spill]] }
  0x61   : > { %s3371_s21 = scalar_lea.hbm %s5266_s3, 16 }
  0x62   : > { %p3372_p6 = scmp.ne.s32.totalorder %s5266_s3, %s3371_s21  ;;  %p3378_p12 = scmp.lt.u32.totalorder %s3371_s21, %s5266_s3 }
  0x64   : > { %p3374_p13 = pnand %p3372_p6, %p3345_p4 }
  0x66   : > { %p3375_p3 = pneg %p3374_p13 }
  0x68   : > { %p3380_p8 = pnand %p3378_p12, %p3375_p3 }
  0x6a   : > { %3383 = shalt.err (!%p3380_p8)
}
  0x6b   : > { %s3384_s27 = scalar_lea.vmem %s4247_s20, 16  ;;  %s3391_s14 = scalar_lea.vmem %s4247_s20, 32 }
  0x6c   : > { %p3385_p2 = scmp.ne.s32.totalorder %s4247_s20, %s3384_s27  ;;  %p3392_p0 = scmp.lt.s32.totalorder %s4247_s20, %s4247_s20 }
  0x6d   : > { %p3393_p5 = scmp.lt.s32.totalorder %s3391_s14, %s3384_s27 }
  0x6e   : > { %p3387_p1 = pnand %p3385_p2, %p3345_p4 }
  0x6f   : > { %p3394_p10 = por %p3393_p5, %p3392_p0 }
  0x70   : > { %p3388_p11 = pneg %p3387_p1 }
  0x72   : > { %p3395_p9 = pnand %p3394_p10, %p3388_p11 }
  0x74   : > { %3398 = shalt.err (!%p3395_p9)
}
  0x75   : > { %3143 = dma.hbm_to_vmem [thread:$0]  (!%p4243_p7), %s5266_s3, 16, %s4247_s20, [#allocation10]  }
  0x76   : > { %p2824_p6 = scmp.ge.s32.totalorder %s3973_s0, 4 }
  0x77   : > { %s5214_s24 = sand.u32 (!%p2824_p6), 1, %s3973_s0   ;;  %s5213_s15 = sand.u32 (!%p2824_p6), 1, %s3953_s26  }
  0x78   : > { %516 = sbr.rel (%p2824_p6) target bundleno = 489 (0x1e9), region = 24  ;;  %s2825_s21 = sshll.u32 (!%p2824_p6), %s5213_s15, 4 }
  0x79   : > { %s2914_s18 = sshll.u32 (!%p2824_p6), %s3969_s30, 8  ;;  %s5267_s10 = sld [smem:[#allocation56_spill]] (!%p2824_p6) }
  0x7a   : > { %s524_s20 = scalar_lea.vmem (!%p2824_p6), [#allocation3], %s2825_s21  ;;  %s4312_s19 = scalar_lea.sflag (!%p2824_p6), [#allocation4], %s5214_s24 }
  0x7b   : > { %s531_s14 = sshll.u32 (!%p2824_p6), %s524_s20, 4  ;;  %p5268_p4 = scmp.ne.s32.totalorder (!%p2824_p6), %s5248_s28, 0  ;;  %s4308_s14 = int_to_ptr.vmem [resolvable:$true] %s531_s14 }
  0x7f   : > { %s4306_s27 = scalar_lea.hbm %s5267_s10, %s2914_s18  ;;  %s3403_s18 = scalar_lea.hbm %s5267_s10, 512 }
  0x80   : > { %s3399_s13 = scalar_lea.hbm %s4306_s27, 256  ;;  %p3404_p12 = scmp.lt.u32.totalorder %s4306_s27, %s5267_s10 }
  0x81   : > { %p3400_p7 = scmp.ne.s32.totalorder %s4306_s27, %s3399_s13  ;;  %p3405_p8 = scmp.lt.u32.totalorder %s3403_s18, %s3399_s13 }
  0x82   : > { %p3407_p1 = scmp.lt.u32.totalorder %s3399_s13, %s4306_s27 }
  0x83   : > { %p3401_p13 = pnand %p3400_p7, %p5268_p4  ;;  %p3406_p2 = por %p3405_p8, %p3404_p12 }
  0x85   : > { %p3402_p3 = pneg %p3401_p13  ;;  %p3408_p11 = por %p3407_p1, %p3406_p2 }
  0x87   : > { %p3409_p0 = pnand %p3408_p11, %p3402_p3 }
  0x89   : > { %3412 = shalt.err (!%p3409_p0)
}
  0x8a   : > { %s3413_s21 = scalar_lea.vmem %s4308_s14, 256  ;;  %s3977_s15 = smov [#allocation3]  }
  0x8b   : > { %p3414_p5 = scmp.ne.s32.totalorder %s4308_s14, %s3413_s21  ;;  %s3417_s20 = sshll.u32 %s3977_s15, 4  ;;  %s3418_s20 = int_to_ptr.vmem [resolvable:$false] %s3417_s20 }
  0x8c   : > { %s3419_s2 = scalar_lea.vmem %s3418_s20, 512  ;;  %p3420_p6 = scmp.lt.s32.totalorder %s4308_s14, %s3418_s20 }
  0x8d   : > { %p3415_p10 = pnand %p3414_p5, %p5268_p4  ;;  %p3421_p7 = scmp.lt.s32.totalorder %s3419_s2, %s3413_s21 }
  0x8f   : > { %p3416_p9 = pneg %p3415_p10  ;;  %p3422_p13 = por %p3421_p7, %p3420_p6 }
  0x91   : > { %p3423_p12 = pnand %p3422_p13, %p3416_p9 }
  0x93   : > { %3426 = shalt.err (!%p3423_p12)
}
  0x94   : > { %s3978_s13 = smov 128   ;;  %s3979_s12 = smov 8  }
  0x95   : > { %3103 = dma.hbm_to_vmem [thread:$0]  (%p5268_p4), %s4306_s27, 256, %s4308_s14, %s4312_s19, %s3978_s13, %s3978_s13, %s3979_s12  }
  0x96   : > { %s5269_s18 = sand.u32 1, %s3953_s26   ;;  %s2915_s15 = sshll.u32 %s3969_s30, 5 }
  0x97   : > { %s2828_s22 = sshll.u32 %s5269_s18, 1  ;;  %s5270_s1 = sld [smem:[#allocation57_spill]] }
  0x98   : > { %s545_s24 = scalar_lea.vmem [#allocation6], %s2828_s22  ;;  %s5271_s10 = sand.u32 1, %s3973_s0  }
  0x99   : > { %s552_s3 = sshll.u32 %s545_s24, 4  ;;  %s4348_s25 = scalar_lea.sflag [#allocation7], %s5271_s10  ;;  %s4344_s3 = int_to_ptr.vmem [resolvable:$true] %s552_s3 }
  0x9d   : > { %s4342_s2 = scalar_lea.hbm %s5270_s1, %s2915_s15  ;;  %s3431_s12 = scalar_lea.hbm %s5270_s1, 64 }
  0x9e   : > { %s3427_s27 = scalar_lea.hbm %s4342_s2, 32  ;;  %p3432_p1 = scmp.lt.u32.totalorder %s4342_s2, %s5270_s1 }
  0x9f   : > { %p3428_p3 = scmp.ne.s32.totalorder %s4342_s2, %s3427_s27  ;;  %p3433_p11 = scmp.lt.u32.totalorder %s3431_s12, %s3427_s27 }
  0xa0   : > { %p3435_p5 = scmp.lt.u32.totalorder %s3427_s27, %s4342_s2 }
  0xa1   : > { %p3429_p8 = pnand %p3428_p3, %p5268_p4  ;;  %p3434_p0 = por %p3433_p11, %p3432_p1 }
  0xa3   : > { %p3430_p2 = pneg %p3429_p8  ;;  %p3436_p10 = por %p3435_p5, %p3434_p0 }
  0xa5   : > { %p3437_p9 = pnand %p3436_p10, %p3430_p2 }
  0xa7   : > { %3440 = shalt.err (!%p3437_p9)
}
  0xa8   : > { %s3441_s24 = scalar_lea.vmem %s4344_s3, 32  ;;  %s3980_s10 = smov [#allocation6]  }
  0xa9   : > { %p3442_p6 = scmp.ne.s32.totalorder %s4344_s3, %s3441_s24  ;;  %s3445_s22 = sshll.u32 %s3980_s10, 4  ;;  %s3446_s22 = int_to_ptr.vmem [resolvable:$false] %s3445_s22 }
  0xaa   : > { %s3447_s20 = scalar_lea.vmem %s3446_s22, 64  ;;  %p3448_p12 = scmp.lt.s32.totalorder %s4344_s3, %s3446_s22 }
  0xab   : > { %p3443_p7 = pnand %p3442_p6, %p5268_p4  ;;  %p3449_p3 = scmp.lt.s32.totalorder %s3447_s20, %s3441_s24 }
  0xad   : > { %p3444_p13 = pneg %p3443_p7  ;;  %p3450_p8 = por %p3449_p3, %p3448_p12 }
  0xaf   : > { %p3451_p1 = pnand %p3450_p8, %p3444_p13 }
  0xb1   : > { %3454 = shalt.err (!%p3451_p1)
}
  0xb2   : > { %s3981_s21 = smov 16   ;;  %s3982_s27 = smov 1  }
  0xb3   : > { %3104 = dma.hbm_to_vmem [thread:$0]  (%p5268_p4), %s4342_s2, 32, %s4344_s3, %s4348_s25, %s3981_s21, %s3981_s21, %s3982_s27  }
  0xb4   : > { %s4373_s14 = sand.u32 1, %s3941_s23   ;;  %s4376_s13 = sshll.u32 %s3965_s29, 8 }
  0xb5   : > { %s4379_s12 = sshll.u32 %s4373_s14, 4  ;;  %s5272_s4 = sld [smem:[#allocation60_spill]] }
  0xb6   : > { %s566_s28 = scalar_lea.vmem [#allocation11], %s4379_s12  ;;  %p5273_p2 = scmp.ne.s32.totalorder %s5254_s11, 0 }
  0xb7   : > { %s573_s3 = sshll.u32 %s566_s28, 4  ;;  %s4388_s3 = int_to_ptr.vmem [resolvable:$true] %s573_s3 }
  0xbb   : > { %s4385_s24 = scalar_lea.hbm %s5272_s4, %s4376_s13  ;;  %s3459_s20 = scalar_lea.hbm %s5272_s4, 512 }
  0xbc   : > { %s3455_s2 = scalar_lea.hbm %s4385_s24, 256  ;;  %p3460_p5 = scmp.lt.u32.totalorder %s4385_s24, %s5272_s4 }
  0xbd   : > { %p3456_p4 = scmp.ne.s32.totalorder %s4385_s24, %s3455_s2  ;;  %p3461_p10 = scmp.lt.u32.totalorder %s3459_s20, %s3455_s2 }
  0xbe   : > { %p3463_p6 = scmp.lt.u32.totalorder %s3455_s2, %s4385_s24 }
  0xbf   : > { %p3457_p11 = pnand %p3456_p4, %p5273_p2  ;;  %p3462_p9 = por %p3461_p10, %p3460_p5 }
  0xc1   : > { %p3458_p0 = pneg %p3457_p11  ;;  %p3464_p7 = por %p3463_p6, %p3462_p9 }
  0xc3   : > { %p3465_p13 = pnand %p3464_p7, %p3458_p0 }
  0xc5   : > { %3468 = shalt.err (!%p3465_p13)
}
  0xc6   : > { %s3469_s18 = scalar_lea.vmem %s4388_s3, 256  ;;  %s3983_s15 = smov [#allocation11]  }
  0xc7   : > { %p3470_p12 = scmp.ne.s32.totalorder %s4388_s3, %s3469_s18  ;;  %s3473_s28 = sshll.u32 %s3983_s15, 4  ;;  %s3474_s28 = int_to_ptr.vmem [resolvable:$false] %s3473_s28 }
  0xc8   : > { %s3475_s10 = scalar_lea.vmem %s3474_s28, 512  ;;  %p3476_p1 = scmp.lt.s32.totalorder %s4388_s3, %s3474_s28 }
  0xc9   : > { %p3471_p3 = pnand %p3470_p12, %p5273_p2  ;;  %p3477_p4 = scmp.lt.s32.totalorder %s3475_s10, %s3469_s18 }
  0xcb   : > { %p3472_p8 = pneg %p3471_p3  ;;  %p3478_p11 = por %p3477_p4, %p3476_p1 }
  0xcd   : > { %p3479_p5 = pnand %p3478_p11, %p3472_p8 }
  0xcf   : > { %3482 = shalt.err (!%p3479_p5)
}
  0xd0   : > { %s5218_s2 = smov 64   ;;  %s5221_s22 = smov 4  }
  0xd1   : > { %3105 = dma.hbm_to_vmem [thread:$0]  (%p5273_p2), %s4385_s24, 256, %s4388_s3, %s4312_s19, %s5218_s2, %s5218_s2, %s5221_s22  }
  0xd2   : > { %s4416_s20 = sshll.u32 %s3965_s29, 4  ;;  %s586_s21 = scalar_lea.vmem [#allocation12], %s4373_s14 }
  0xd3   : > { %s593_s27 = sshll.u32 %s586_s21, 4  ;;  %s5274_s5 = sld [smem:[#allocation61_spill]]  ;;  %s594_s27 = int_to_ptr.vmem [resolvable:$true] %s593_s27 }
  0xd9   : > { %s591_s28 = scalar_lea.hbm %s5274_s5, %s4416_s20  ;;  %s3487_s30 = scalar_lea.hbm %s5274_s5, 32 }
  0xda   : > { %s3483_s10 = scalar_lea.hbm %s591_s28, 16  ;;  %p3488_p6 = scmp.lt.u32.totalorder %s591_s28, %s5274_s5 }
  0xdb   : > { %p3484_p0 = scmp.ne.s32.totalorder %s591_s28, %s3483_s10  ;;  %p3489_p7 = scmp.lt.u32.totalorder %s3487_s30, %s3483_s10 }
  0xdc   : > { %p3491_p12 = scmp.lt.u32.totalorder %s3483_s10, %s591_s28 }
  0xdd   : > { %p3485_p10 = pnand %p3484_p0, %p5273_p2  ;;  %p3490_p13 = por %p3489_p7, %p3488_p6 }
  0xdf   : > { %p3486_p9 = pneg %p3485_p10  ;;  %p3492_p3 = por %p3491_p12, %p3490_p13 }
  0xe1   : > { %p3493_p8 = pnand %p3492_p3, %p3486_p9 }
  0xe3   : > { %3496 = shalt.err (!%p3493_p8)
}
  0xe4   : > { %s3497_s21 = scalar_lea.vmem %s594_s27, 16  ;;  %s3986_s18 = smov [#allocation12]  }
  0xe5   : > { %p3498_p1 = scmp.ne.s32.totalorder %s594_s27, %s3497_s21  ;;  %s3501_s15 = sshll.u32 %s3986_s18, 4  ;;  %s3502_s15 = int_to_ptr.vmem [resolvable:$false] %s3501_s15 }
  0xe6   : > { %s3503_s1 = scalar_lea.vmem %s3502_s15, 32  ;;  %p3504_p5 = scmp.lt.s32.totalorder %s594_s27, %s3502_s15 }
  0xe7   : > { %p3499_p4 = pnand %p3498_p1, %p5273_p2  ;;  %p3505_p0 = scmp.lt.s32.totalorder %s3503_s1, %s3497_s21 }
  0xe9   : > { %p3500_p11 = pneg %p3499_p4  ;;  %p3506_p10 = por %p3505_p0, %p3504_p5 }
  0xeb   : > { %p3507_p6 = pnand %p3506_p10, %p3500_p11 }
  0xed   : > { %3510 = shalt.err (!%p3507_p6)
}
  0xee   : > { %3106 = dma.hbm_to_vmem [thread:$0]  (%p5273_p2), %s591_s28, 16, %s594_s27, %s4348_s25  }
  0xef   : > { %s5275_s6 = sld [smem:[#allocation62_spill]]  ;;  %s604_s24 = scalar_lea.vmem [#allocation13], %s4379_s12 }
  0xf0   : > { %s611_s3 = sshll.u32 %s604_s24, 4  ;;  %s5276_s7 = sld [smem:[#allocation63_spill]]  ;;  %s4443_s3 = int_to_ptr.vmem [resolvable:$true] %s611_s3 }
  0xf5   : > { %s4440_s10 = scalar_lea.hbm %s5275_s6, %s4376_s13  ;;  %s3515_s4 = scalar_lea.hbm %s5275_s6, 512 }
  0xf6   : > { %s4449_s15 = scalar_lea.hbm %s5276_s7, %s4416_s20  ;;  %s3511_s1 = scalar_lea.hbm %s4440_s10, 256 }
  0xf7   : > { %p3512_p9 = scmp.ne.s32.totalorder %s4440_s10, %s3511_s1  ;;  %p3516_p12 = scmp.lt.u32.totalorder %s4440_s10, %s5275_s6 }
  0xf8   : > { %p3517_p3 = scmp.lt.u32.totalorder %s3515_s4, %s3511_s1  ;;  %p3519_p1 = scmp.lt.u32.totalorder %s3511_s1, %s4440_s10 }
  0xf9   : > { %p3513_p7 = pnand %p3512_p9, %p5273_p2 }
  0xfa   : > { %p3518_p8 = por %p3517_p3, %p3516_p12 }
  0xfb   : > { %p3514_p13 = pneg %p3513_p7 }
  0xfc   : > { %p3520_p4 = por %p3519_p1, %p3518_p8 }
  0xfe   : > { %p3521_p11 = pnand %p3520_p4, %p3514_p13 }
 0x100   : > { %3524 = shalt.err (!%p3521_p11)
}
 0x101   : > { %s3525_s24 = scalar_lea.vmem %s4443_s3, 256  ;;  %s3987_s21 = smov [#allocation13]  }
 0x102   : > { %p3526_p5 = scmp.ne.s32.totalorder %s4443_s3, %s3525_s24  ;;  %s3529_s18 = sshll.u32 %s3987_s21, 4  ;;  %s3530_s18 = int_to_ptr.vmem [resolvable:$false] %s3529_s18 }
 0x103   : > { %s3531_s2 = scalar_lea.vmem %s3530_s18, 512  ;;  %p3532_p6 = scmp.lt.s32.totalorder %s4443_s3, %s3530_s18 }
 0x104   : > { %p3527_p0 = pnand %p3526_p5, %p5273_p2  ;;  %p3533_p9 = scmp.lt.s32.totalorder %s3531_s2, %s3525_s24 }
 0x106   : > { %p3528_p10 = pneg %p3527_p0  ;;  %p3534_p7 = por %p3533_p9, %p3532_p6 }
 0x108   : > { %p3535_p12 = pnand %p3534_p7, %p3528_p10 }
 0x10a   : > { %3538 = shalt.err (!%p3535_p12)
}
 0x10b   : > { %s5277_s1 = smov 64   ;;  %s624_s27 = scalar_lea.vmem [#allocation14], %s4373_s14 }
 0x10c   : > { %3107 = dma.hbm_to_vmem [thread:$0]  (%p5273_p2), %s4440_s10, 256, %s4443_s3, %s4312_s19, %s5277_s1, %s5277_s1, %s5221_s22  }
 0x10d   : > { %s631_s28 = sshll.u32 %s624_s27, 4  ;;  %s4481_s24 = scalar_lea.hbm %s5176_s8, %s4416_s20  ;;  %s632_s28 = int_to_ptr.vmem [resolvable:$true] %s631_s28 }
 0x10e   : > { %s3539_s21 = scalar_lea.hbm %s4449_s15, 16  ;;  %s3543_s5 = scalar_lea.hbm %s5276_s7, 32 }
 0x10f   : > { %p3540_p13 = scmp.ne.s32.totalorder %s4449_s15, %s3539_s21  ;;  %p3544_p1 = scmp.lt.u32.totalorder %s4449_s15, %s5276_s7 }
 0x110   : > { %p3545_p4 = scmp.lt.u32.totalorder %s3543_s5, %s3539_s21  ;;  %p3547_p5 = scmp.lt.u32.totalorder %s3539_s21, %s4449_s15 }
 0x111   : > { %p3541_p3 = pnand %p3540_p13, %p5273_p2 }
 0x112   : > { %p3546_p11 = por %p3545_p4, %p3544_p1 }
 0x113   : > { %p3542_p8 = pneg %p3541_p3 }
 0x114   : > { %p3548_p0 = por %p3547_p5, %p3546_p11 }
 0x116   : > { %p3549_p10 = pnand %p3548_p0, %p3542_p8 }
 0x118   : > { %3552 = shalt.err (!%p3549_p10)
}
 0x119   : > { %s3553_s10 = scalar_lea.vmem %s632_s28, 16  ;;  %s3988_s3 = smov [#allocation14]  }
 0x11a   : > { %p3554_p6 = scmp.ne.s32.totalorder %s632_s28, %s3553_s10  ;;  %s3557_s27 = sshll.u32 %s3988_s3, 4  ;;  %s3558_s27 = int_to_ptr.vmem [resolvable:$false] %s3557_s27 }
 0x11b   : > { %s3559_s4 = scalar_lea.vmem %s3558_s27, 32  ;;  %p3560_p12 = scmp.lt.s32.totalorder %s632_s28, %s3558_s27 }
 0x11c   : > { %p3555_p9 = pnand %p3554_p6, %p5273_p2  ;;  %p3561_p13 = scmp.lt.s32.totalorder %s3559_s4, %s3553_s10 }
 0x11e   : > { %p3556_p7 = pneg %p3555_p9  ;;  %p3562_p3 = por %p3561_p13, %p3560_p12 }
 0x120   : > { %p3563_p1 = pnand %p3562_p3, %p3556_p7 }
 0x122   : > { %3566 = shalt.err (!%p3563_p1)
}
 0x123   : > { %3108 = dma.hbm_to_vmem [thread:$0]  (%p5273_p2), %s4449_s15, 16, %s632_s28, %s4348_s25  }
 0x124   : > { %s641_s5 = scalar_lea.vmem [#allocation15], %s4373_s14  ;;  %s4506_s21 = scalar_lea.hbm %s5177_s9, %s4416_s20 }
 0x125   : > { %s648_s6 = sshll.u32 %s641_s5, 4  ;;  %s3567_s18 = scalar_lea.hbm %s4481_s24, 16  ;;  %s649_s6 = int_to_ptr.vmem [resolvable:$true] %s648_s6 }
 0x126   : > { %p3568_p8 = scmp.ne.s32.totalorder %s4481_s24, %s3567_s18  ;;  %s3571_s3 = scalar_lea.hbm %s5176_s8, 32 }
 0x127   : > { %p3572_p5 = scmp.lt.u32.totalorder %s4481_s24, %s5176_s8  ;;  %p3573_p0 = scmp.lt.u32.totalorder %s3571_s3, %s3567_s18 }
 0x128   : > { %p3569_p4 = pnand %p3568_p8, %p5273_p2  ;;  %p3575_p6 = scmp.lt.u32.totalorder %s3567_s18, %s4481_s24 }
 0x129   : > { %p3574_p10 = por %p3573_p0, %p3572_p5 }
 0x12a   : > { %p3570_p11 = pneg %p3569_p4 }
 0x12b   : > { %p3576_p9 = por %p3575_p6, %p3574_p10 }
 0x12d   : > { %p3577_p7 = pnand %p3576_p9, %p3570_p11 }
 0x12f   : > { %3580 = shalt.err (!%p3577_p7)
}
 0x130   : > { %s3581_s15 = scalar_lea.vmem %s649_s6, 16  ;;  %s3989_s28 = smov [#allocation15]  }
 0x131   : > { %p3582_p12 = scmp.ne.s32.totalorder %s649_s6, %s3581_s15  ;;  %s3585_s5 = sshll.u32 %s3989_s28, 4  ;;  %s3586_s5 = int_to_ptr.vmem [resolvable:$false] %s3585_s5 }
 0x132   : > { %s3587_s26 = scalar_lea.vmem %s3586_s5, 32  ;;  %p3588_p1 = scmp.lt.s32.totalorder %s649_s6, %s3586_s5 }
 0x133   : > { %p3583_p13 = pnand %p3582_p12, %p5273_p2  ;;  %p3589_p8 = scmp.lt.s32.totalorder %s3587_s26, %s3581_s15 }
 0x135   : > { %p3584_p3 = pneg %p3583_p13  ;;  %p3590_p4 = por %p3589_p8, %p3588_p1 }
 0x137   : > { %p3591_p0 = pnand %p3590_p4, %p3584_p3 }
 0x139   : > { %3594 = shalt.err (!%p3591_p0)
}
 0x13a   : > { %3109 = dma.hbm_to_vmem [thread:$0]  (%p5273_p2), %s4481_s24, 16, %s649_s6, %s4312_s19  }
 0x13b   : > { %s658_s30 = scalar_lea.vmem [#allocation16], %s4373_s14  ;;  %s5278_s3 = sld [smem:[#allocation64_spill]] }
 0x13c   : > { %s665_s18 = sshll.u32 %s658_s30, 4  ;;  %s3595_s4 = scalar_lea.hbm %s4506_s21, 16  ;;  %s666_s18 = int_to_ptr.vmem [resolvable:$true] %s665_s18 }
 0x13d   : > { %p3596_p11 = scmp.ne.s32.totalorder %s4506_s21, %s3595_s4  ;;  %s3599_s5 = scalar_lea.hbm %s5177_s9, 32 }
 0x13e   : > { %p3600_p6 = scmp.lt.u32.totalorder %s4506_s21, %s5177_s9  ;;  %p3601_p9 = scmp.lt.u32.totalorder %s3599_s5, %s3595_s4 }
 0x13f   : > { %p3597_p5 = pnand %p3596_p11, %p5273_p2  ;;  %p3603_p12 = scmp.lt.u32.totalorder %s3595_s4, %s4506_s21 }
 0x140   : > { %p3602_p7 = por %p3601_p9, %p3600_p6 }
 0x141   : > { %s4531_s27 = scalar_lea.hbm %s5278_s3, %s4376_s13  ;;  %p3598_p10 = pneg %p3597_p5 }
 0x142   : > { %p3604_p13 = por %p3603_p12, %p3602_p7 }
 0x144   : > { %p3605_p3 = pnand %p3604_p13, %p3598_p10 }
 0x146   : > { %3608 = shalt.err (!%p3605_p3)
}
 0x147   : > { %s3609_s13 = scalar_lea.vmem %s666_s18, 16  ;;  %s3990_s24 = smov [#allocation16]  }
 0x148   : > { %p3610_p1 = scmp.ne.s32.totalorder %s666_s18, %s3609_s13  ;;  %s3613_s6 = sshll.u32 %s3990_s24, 4  ;;  %s3614_s6 = int_to_ptr.vmem [resolvable:$false] %s3613_s6 }
 0x149   : > { %s3615_s30 = scalar_lea.vmem %s3614_s6, 32  ;;  %p3616_p0 = scmp.lt.s32.totalorder %s666_s18, %s3614_s6 }
 0x14a   : > { %p3611_p8 = pnand %p3610_p1, %p5273_p2  ;;  %p3617_p11 = scmp.lt.s32.totalorder %s3615_s30, %s3609_s13 }
 0x14c   : > { %p3612_p4 = pneg %p3611_p8  ;;  %p3618_p5 = por %p3617_p11, %p3616_p0 }
 0x14e   : > { %p3619_p6 = pnand %p3618_p5, %p3612_p4 }
 0x150   : > { %3622 = shalt.err (!%p3619_p6)
}
 0x151   : > { %3110 = dma.hbm_to_vmem [thread:$0]  (%p5273_p2), %s4506_s21, 16, %s666_s18, %s4348_s25  }
 0x152   : > { %s676_s22 = scalar_lea.vmem [#allocation17], %s4379_s12  ;;  %s5279_s15 = sld [smem:[#allocation65_spill]] }
 0x153   : > { %s683_s2 = sshll.u32 %s676_s22, 4  ;;  %s3623_s5 = scalar_lea.hbm %s4531_s27, 256  ;;  %s4552_s2 = int_to_ptr.vmem [resolvable:$true] %s683_s2 }
 0x154   : > { %p3624_p10 = scmp.ne.s32.totalorder %s4531_s27, %s3623_s5  ;;  %s3627_s24 = scalar_lea.hbm %s5278_s3, 512 }
 0x155   : > { %p3628_p12 = scmp.lt.u32.totalorder %s4531_s27, %s5278_s3  ;;  %p3629_p13 = scmp.lt.u32.totalorder %s3627_s24, %s3623_s5 }
 0x156   : > { %p3625_p9 = pnand %p3624_p10, %p5273_p2  ;;  %p3631_p1 = scmp.lt.u32.totalorder %s3623_s5, %s4531_s27 }
 0x157   : > { %p3630_p3 = por %p3629_p13, %p3628_p12 }
 0x158   : > { %s4558_s28 = scalar_lea.hbm %s5279_s15, %s4416_s20  ;;  %p3626_p7 = pneg %p3625_p9 }
 0x159   : > { %p3632_p8 = por %p3631_p1, %p3630_p3 }
 0x15b   : > { %p3633_p4 = pnand %p3632_p8, %p3626_p7 }
 0x15d   : > { %3636 = shalt.err (!%p3633_p4)
}
 0x15e   : > { %s3637_s12 = scalar_lea.vmem %s4552_s2, 256  ;;  %s3991_s18 = smov [#allocation17]  }
 0x15f   : > { %p3638_p0 = scmp.ne.s32.totalorder %s4552_s2, %s3637_s12  ;;  %s3641_s30 = sshll.u32 %s3991_s18, 4  ;;  %s3642_s30 = int_to_ptr.vmem [resolvable:$false] %s3641_s30 }
 0x160   : > { %s3643_s22 = scalar_lea.vmem %s3642_s30, 512  ;;  %p3644_p6 = scmp.lt.s32.totalorder %s4552_s2, %s3642_s30 }
 0x161   : > { %p3639_p11 = pnand %p3638_p0, %p5273_p2  ;;  %p3645_p10 = scmp.lt.s32.totalorder %s3643_s22, %s3637_s12 }
 0x163   : > { %p3640_p5 = pneg %p3639_p11  ;;  %p3646_p9 = por %p3645_p10, %p3644_p6 }
 0x165   : > { %p3647_p12 = pnand %p3646_p9, %p3640_p5 }
 0x167   : > { %3650 = shalt.err (!%p3647_p12)
}
 0x168   : > { %s5280_s10 = smov 4   ;;  %s696_s4 = scalar_lea.vmem [#allocation18], %s4373_s14 }
 0x169   : > { %3111 = dma.hbm_to_vmem [thread:$0]  (%p5273_p2), %s4531_s27, 256, %s4552_s2, %s4312_s19, %s5277_s1, %s5277_s1, %s5280_s10  }
 0x16a   : > { %s703_s5 = sshll.u32 %s696_s4, 4  ;;  %s2845_s26 = sshll.u32 %s4373_s14, 5  ;;  %s704_s5 = int_to_ptr.vmem [resolvable:$true] %s703_s5 }
 0x16b   : > { %s3651_s13 = scalar_lea.hbm %s4558_s28, 16  ;;  %s3655_s21 = scalar_lea.hbm %s5279_s15, 32 }
 0x16c   : > { %p3652_p7 = scmp.ne.s32.totalorder %s4558_s28, %s3651_s13  ;;  %p3656_p1 = scmp.lt.u32.totalorder %s4558_s28, %s5279_s15 }
 0x16d   : > { %p3657_p8 = scmp.lt.u32.totalorder %s3655_s21, %s3651_s13  ;;  %p3659_p0 = scmp.lt.u32.totalorder %s3651_s13, %s4558_s28 }
 0x16e   : > { %p3653_p13 = pnand %p3652_p7, %p5273_p2 }
 0x16f   : > { %p3658_p4 = por %p3657_p8, %p3656_p1 }
 0x170   : > { %p3654_p3 = pneg %p3653_p13 }
 0x171   : > { %p3660_p11 = por %p3659_p0, %p3658_p4 }
 0x173   : > { %p3661_p5 = pnand %p3660_p11, %p3654_p3 }
 0x175   : > { %3664 = shalt.err (!%p3661_p5)
}
 0x176   : > { %s3665_s27 = scalar_lea.vmem %s704_s5, 16  ;;  %s3992_s2 = smov [#allocation18]  }
 0x177   : > { %p3666_p6 = scmp.ne.s32.totalorder %s704_s5, %s3665_s27  ;;  %s3669_s30 = sshll.u32 %s3992_s2, 4  ;;  %s3670_s30 = int_to_ptr.vmem [resolvable:$false] %s3669_s30 }
 0x178   : > { %s3671_s22 = scalar_lea.vmem %s3670_s30, 32  ;;  %p3672_p12 = scmp.lt.s32.totalorder %s704_s5, %s3670_s30 }
 0x179   : > { %p3667_p10 = pnand %p3666_p6, %p5273_p2  ;;  %p3673_p7 = scmp.lt.s32.totalorder %s3671_s22, %s3665_s27 }
 0x17b   : > { %p3668_p9 = pneg %p3667_p10  ;;  %p3674_p13 = por %p3673_p7, %p3672_p12 }
 0x17d   : > { %p3675_p1 = pnand %p3674_p13, %p3668_p9 }
 0x17f   : > { %3678 = shalt.err (!%p3675_p1)
}
 0x180   : > { %3112 = dma.hbm_to_vmem [thread:$0]  (%p5273_p2), %s4558_s28, 16, %s704_s5, %s4348_s25  }
 0x181   : > { %s2919_s4 = sshll.u32 %s3965_s29, 9  ;;  %s714_s13 = scalar_lea.vmem [#allocation19], %s2845_s26 }
 0x182   : > { %s721_s24 = sshll.u32 %s714_s13, 4  ;;  %s5281_s12 = sld [smem:[#allocation66_spill]]  ;;  %s4613_s24 = int_to_ptr.vmem [resolvable:$true] %s721_s24 }
 0x188   : > { %s4611_s18 = scalar_lea.hbm %s5281_s12, %s2919_s4  ;;  %s3683_s26 = scalar_lea.hbm %s5281_s12, 1024 }
 0x189   : > { %s3679_s27 = scalar_lea.hbm %s4611_s18, 512  ;;  %p3684_p0 = scmp.lt.u32.totalorder %s4611_s18, %s5281_s12 }
 0x18a   : > { %p3680_p3 = scmp.ne.s32.totalorder %s4611_s18, %s3679_s27  ;;  %p3685_p11 = scmp.lt.u32.totalorder %s3683_s26, %s3679_s27 }
 0x18b   : > { %p3687_p6 = scmp.lt.u32.totalorder %s3679_s27, %s4611_s18 }
 0x18c   : > { %p3681_p8 = pnand %p3680_p3, %p5273_p2  ;;  %p3686_p5 = por %p3685_p11, %p3684_p0 }
 0x18e   : > { %p3682_p4 = pneg %p3681_p8  ;;  %p3688_p10 = por %p3687_p6, %p3686_p5 }
 0x190   : > { %p3689_p9 = pnand %p3688_p10, %p3682_p4 }
 0x192   : > { %3692 = shalt.err (!%p3689_p9)
}
 0x193   : > { %s3693_s22 = scalar_lea.vmem %s4613_s24, 512  ;;  %s3993_s4 = smov [#allocation19]  }
 0x194   : > { %p3694_p12 = scmp.ne.s32.totalorder %s4613_s24, %s3693_s22  ;;  %s3697_s13 = sshll.u32 %s3993_s4, 4  ;;  %s3698_s13 = int_to_ptr.vmem [resolvable:$false] %s3697_s13 }
 0x195   : > { %s3699_s6 = scalar_lea.vmem %s3698_s13, 1024  ;;  %p3700_p1 = scmp.lt.s32.totalorder %s4613_s24, %s3698_s13 }
 0x196   : > { %p3695_p7 = pnand %p3694_p12, %p5273_p2  ;;  %p3701_p3 = scmp.lt.s32.totalorder %s3699_s6, %s3693_s22 }
 0x198   : > { %p3696_p13 = pneg %p3695_p7  ;;  %p3702_p8 = por %p3701_p3, %p3700_p1 }
 0x19a   : > { %p3703_p0 = pnand %p3702_p8, %p3696_p13 }
 0x19c   : > { %3706 = shalt.err (!%p3703_p0)
}
 0x19d   : > { %3113 = dma.hbm_to_vmem [thread:$0]  (%p5273_p2), %s4611_s18, 512, %s4613_s24, %s4312_s19, %s5277_s1, %s5277_s1, %s5280_s10  }
 0x19e   : > { %s5282_s28 = sld [smem:[#allocation67_spill]]  ;;  %s734_s2 = scalar_lea.vmem [#allocation20], %s4373_s14 }
 0x19f   : > { %s741_s30 = sshll.u32 %s734_s2, 4  ;;  %s5284_s13 = sld [smem:[#allocation68_spill]]  ;;  %s742_s30 = int_to_ptr.vmem [resolvable:$true] %s741_s30 }
 0x1a4   : > { %s5283_s5 = smov %s5282_s28  ;;  %s4644_s26 = scalar_lea.hbm %s5282_s28, %s4416_s20 }
 0x1a5   : > { %s4651_s6 = scalar_lea.hbm %s5284_s13, %s4416_s20  ;;  %s3707_s3 = scalar_lea.hbm %s4644_s26, 16 }
 0x1a6   : > { %p3708_p4 = scmp.ne.s32.totalorder %s4644_s26, %s3707_s3  ;;  %s3711_s24 = scalar_lea.hbm %s5283_s5, 32 }
 0x1a7   : > { %p3712_p6 = scmp.lt.u32.totalorder %s4644_s26, %s5283_s5  ;;  %p3713_p10 = scmp.lt.u32.totalorder %s3711_s24, %s3707_s3 }
 0x1a8   : > { %p3709_p11 = pnand %p3708_p4, %p5273_p2  ;;  %p3715_p12 = scmp.lt.u32.totalorder %s3707_s3, %s4644_s26 }
 0x1a9   : > { %p3714_p9 = por %p3713_p10, %p3712_p6 }
 0x1aa   : > { %p3710_p5 = pneg %p3709_p11 }
 0x1ab   : > { %p3716_p7 = por %p3715_p12, %p3714_p9 }
 0x1ad   : > { %p3717_p13 = pnand %p3716_p7, %p3710_p5 }
 0x1af   : > { %3720 = shalt.err (!%p3717_p13)
}
 0x1b0   : > { %s3721_s27 = scalar_lea.vmem %s742_s30, 16  ;;  %s3994_s28 = smov [#allocation20]  }
 0x1b1   : > { %p3722_p1 = scmp.ne.s32.totalorder %s742_s30, %s3721_s27  ;;  %s3725_s2 = sshll.u32 %s3994_s28, 4  ;;  %s3726_s2 = int_to_ptr.vmem [resolvable:$false] %s3725_s2 }
 0x1b2   : > { %s3727_s22 = scalar_lea.vmem %s3726_s2, 32  ;;  %p3728_p0 = scmp.lt.s32.totalorder %s742_s30, %s3726_s2 }
 0x1b3   : > { %p3723_p3 = pnand %p3722_p1, %p5273_p2  ;;  %p3729_p4 = scmp.lt.s32.totalorder %s3727_s22, %s3721_s27 }
 0x1b5   : > { %p3724_p8 = pneg %p3723_p3  ;;  %p3730_p11 = por %p3729_p4, %p3728_p0 }
 0x1b7   : > { %p3731_p6 = pnand %p3730_p11, %p3724_p8 }
 0x1b9   : > { %3734 = shalt.err (!%p3731_p6)
}
 0x1ba   : > { %3114 = dma.hbm_to_vmem [thread:$0]  (%p5273_p2), %s4644_s26, 16, %s742_s30, %s4348_s25  }
 0x1bb   : > { %s751_s3 = scalar_lea.vmem [#allocation21], %s4373_s14  ;;  %s5285_s24 = sld [smem:[#allocation69_spill]] }
 0x1bc   : > { %s758_s4 = sshll.u32 %s751_s3, 4  ;;  %s3735_s27 = scalar_lea.hbm %s4651_s6, 16  ;;  %s759_s4 = int_to_ptr.vmem [resolvable:$true] %s758_s4 }
 0x1bd   : > { %p3736_p5 = scmp.ne.s32.totalorder %s4651_s6, %s3735_s27  ;;  %s3739_s22 = scalar_lea.hbm %s5284_s13, 32 }
 0x1be   : > { %p3740_p12 = scmp.lt.u32.totalorder %s4651_s6, %s5284_s13  ;;  %p3741_p7 = scmp.lt.u32.totalorder %s3739_s22, %s3735_s27 }
 0x1bf   : > { %p3737_p10 = pnand %p3736_p5, %p5273_p2  ;;  %p3743_p1 = scmp.lt.u32.totalorder %s3735_s27, %s4651_s6 }
 0x1c0   : > { %p3742_p13 = por %p3741_p7, %p3740_p12 }
 0x1c1   : > { %s5286_s18 = smov %s5285_s24  ;;  %s4676_s21 = scalar_lea.hbm %s5285_s24, %s4416_s20 }
 0x1c2   : > { %p3738_p9 = pneg %p3737_p10  ;;  %p3744_p3 = por %p3743_p1, %p3742_p13 }
 0x1c4   : > { %p3745_p8 = pnand %p3744_p3, %p3738_p9 }
 0x1c6   : > { %3748 = shalt.err (!%p3745_p8)
}
 0x1c7   : > { %s3749_s20 = scalar_lea.vmem %s759_s4, 16  ;;  %s3995_s26 = smov [#allocation21]  }
 0x1c8   : > { %p3750_p0 = scmp.ne.s32.totalorder %s759_s4, %s3749_s20  ;;  %s3753_s30 = sshll.u32 %s3995_s26, 4  ;;  %s3754_s30 = int_to_ptr.vmem [resolvable:$false] %s3753_s30 }
 0x1c9   : > { %s3755_s3 = scalar_lea.vmem %s3754_s30, 32  ;;  %p3756_p6 = scmp.lt.s32.totalorder %s759_s4, %s3754_s30 }
 0x1ca   : > { %p3751_p4 = pnand %p3750_p0, %p5273_p2  ;;  %p3757_p5 = scmp.lt.s32.totalorder %s3755_s3, %s3749_s20 }
 0x1cc   : > { %p3752_p11 = pneg %p3751_p4  ;;  %p3758_p10 = por %p3757_p5, %p3756_p6 }
 0x1ce   : > { %p3759_p7 = pnand %p3758_p10, %p3752_p11 }
 0x1d0   : > { %3762 = shalt.err (!%p3759_p7)
}
 0x1d1   : > { %3115 = dma.hbm_to_vmem [thread:$0]  (%p5273_p2), %s4651_s6, 16, %s759_s4, %s4312_s19  }
 0x1d2   : > { %s768_s7 = scalar_lea.vmem [#allocation22], %s4373_s14  ;;  %s3763_s1 = scalar_lea.hbm %s4676_s21, 16 }
 0x1d3   : > { %s775_s5 = sshll.u32 %s768_s7, 4  ;;  %p3764_p9 = scmp.ne.s32.totalorder %s4676_s21, %s3763_s1  ;;  %s776_s5 = int_to_ptr.vmem [resolvable:$true] %s775_s5 }
 0x1d4   : > { %s3767_s27 = scalar_lea.hbm %s5286_s18, 32  ;;  %p3768_p1 = scmp.lt.u32.totalorder %s4676_s21, %s5286_s18 }
 0x1d5   : > { %p3765_p12 = pnand %p3764_p9, %p5273_p2  ;;  %p3769_p3 = scmp.lt.u32.totalorder %s3767_s27, %s3763_s1 }
 0x1d6   : > { %p3771_p0 = scmp.lt.u32.totalorder %s3763_s1, %s4676_s21 }
 0x1d7   : > { %p3766_p13 = pneg %p3765_p12  ;;  %p3770_p8 = por %p3769_p3, %p3768_p1 }
 0x1d9   : > { %p3772_p4 = por %p3771_p0, %p3770_p8 }
 0x1db   : > { %p3773_p11 = pnand %p3772_p4, %p3766_p13 }
 0x1dd   : > { %3776 = shalt.err (!%p3773_p11)
}
 0x1de   : > { %s3777_s19 = scalar_lea.vmem %s776_s5, 16  ;;  %s3996_s14 = smov [#allocation22]  }
 0x1df   : > { %p3778_p6 = scmp.ne.s32.totalorder %s776_s5, %s3777_s19  ;;  %s3781_s6 = sshll.u32 %s3996_s14, 4  ;;  %s3782_s6 = int_to_ptr.vmem [resolvable:$false] %s3781_s6 }
 0x1e0   : > { %s3783_s4 = scalar_lea.vmem %s3782_s6, 32  ;;  %p3784_p7 = scmp.lt.s32.totalorder %s776_s5, %s3782_s6 }
 0x1e1   : > { %p3779_p5 = pnand %p3778_p6, %p5273_p2  ;;  %p3785_p9 = scmp.lt.s32.totalorder %s3783_s4, %s3777_s19 }
 0x1e3   : > { %p3780_p10 = pneg %p3779_p5  ;;  %p3786_p12 = por %p3785_p9, %p3784_p7 }
 0x1e5   : > { %p3787_p1 = pnand %p3786_p12, %p3780_p10 }
 0x1e7   : > { %3790 = shalt.err (!%p3787_p1)
}
 0x1e8   : > { %3116 = dma.hbm_to_vmem [thread:$0]  (%p5273_p2), %s4676_s21, 16, %s776_s5, %s4348_s25  }
 0x1e9 PF: > { %p5287_p13 = scmp.ne.s32.totalorder %s5263_s16, 0 }
 0x1ea   : > { %s5288_s22 = sld [smem:[#allocation43_spill]] (!%p5287_p13)  ;;  %s5289_s20 = sld [smem:[#allocation50_spill]] (!%p5287_p13) }
 0x1eb   : > { %784 = sbr.rel (%p5287_p13) target bundleno = 5066 (0x13ca), region = 84  ;;  %s786_s26 = sand.u32 (!%p5287_p13), 1, %s4156_s17  }
 0x1ec   : > { %s4722_s7 = scalar_lea.sflag (!%p5287_p13), [#allocation4], %s786_s26 }
 0x1f0   : > { %s4719_s30 = sand.u32 (!%p5287_p13), 1, %s5288_s22   ;;  %p5290_p3 = scmp.ne.s32.totalorder (!%p5287_p13), %s5289_s20, 0 }
 0x1f1   : > { %s2852_s3 = sshll.u32 (!%p5287_p13), %s4719_s30, 4 }
 0x1f2   : > { %s4724_s1 = scalar_lea.vmem [#allocation3], %s2852_s3 }
 0x1f3   : > { %3864 = dma.done.wait (%p5290_p3), %s4722_s7, 256  }
 0x1f4   : > { %3866 = vsyncadd (%p5290_p3), %s4722_s7, 4294967040  ;;  %s2853_s11 = sshll.u32 %s4719_s30, 1  ;;  %s4733_s25 = scalar_lea.sflag [#allocation7], %s786_s26 }
 0x1f5   : > { %s4737_s16 = scalar_lea.vmem [#allocation6], %s2853_s11 }
 0x1f6   : > { %3868 = dma.done.wait (%p5290_p3), %s4733_s25, 32  }
 0x1f7   : > { %3870 = vsyncadd (%p5290_p3), %s4733_s25, 4294967264  ;;  %p5291_p2 = scmp.eq.s32.totalorder %s4156_s17, 0 }
 0x1f9   : > { %3872 = dma.done.wait (%p5291_p2), [#allocation7], 16   ;;  %p5292_p8 = pmov %p5291_p2 }
 0x1fa   : > { %p5293_p0 = pmov %p5291_p2 }
 0x1fb   : > { %3874 = vsyncadd (%p5292_p8), [#allocation7], 4294967280 }
 0x1fc   : > { %3876 = dma.done.wait (%p5293_p0), [#allocation10], 16   ;;  %p5294_p4 = pmov %p5293_p0 }
 0x1fd   : > { %s5295_s21 = sld [smem:[#allocation41_spill]]  ;;  %s5296_s5 = sld [smem:[#allocation53_spill]] }
 0x1fe   : > { %3878 = vsyncadd (%p5294_p4), [#allocation10], 4294967280 }
 0x203   : > { %s4754_s10 = sand.u32 1, %s5295_s21   ;;  %p5297_p11 = scmp.ne.s32.totalorder %s5296_s5, 0 }
 0x204   : > { %s4757_s24 = sshll.u32 %s4754_s10, 4 }
 0x205   : > { %s816_s27 = scalar_lea.vmem [#allocation11], %s4757_s24 }
 0x206   : > { %3880 = dma.done.wait (%p5297_p11), %s4722_s7, 256  }
 0x207   : > { %3882 = vsyncadd (%p5297_p11), %s4722_s7, 4294967040  ;;  %s824_s17 = scalar_lea.vmem [#allocation12], %s4754_s10 }
 0x208   : > { %3884 = dma.done.wait (%p5297_p11), %s4733_s25, 16  }
 0x209   : > { %3886 = vsyncadd (%p5297_p11), %s4733_s25, 4294967280  ;;  %s833_s28 = scalar_lea.vmem [#allocation13], %s4757_s24 }
 0x20a   : > { %3888 = dma.done.wait (%p5297_p11), %s4722_s7, 256  }
 0x20b   : > { %3890 = vsyncadd (%p5297_p11), %s4722_s7, 4294967040  ;;  %s841_s2 = scalar_lea.vmem [#allocation14], %s4754_s10 }
 0x20c   : > { %3892 = dma.done.wait (%p5297_p11), %s4733_s25, 16  }
 0x20d   : > { %3894 = vsyncadd (%p5297_p11), %s4733_s25, 4294967280  ;;  %s849_s19 = scalar_lea.vmem [#allocation15], %s4754_s10 }
 0x20e   : > { %3896 = dma.done.wait (%p5297_p11), %s4722_s7, 16  }
 0x20f   : > { %3898 = vsyncadd (%p5297_p11), %s4722_s7, 4294967280  ;;  %s857_s14 = scalar_lea.vmem [#allocation16], %s4754_s10 }
 0x210   : > { %3900 = dma.done.wait (%p5297_p11), %s4733_s25, 16  }
 0x211   : > { %3902 = vsyncadd (%p5297_p11), %s4733_s25, 4294967280  ;;  %s866_s6 = scalar_lea.vmem [#allocation17], %s4757_s24 }
 0x212   : > { %3904 = dma.done.wait (%p5297_p11), %s4722_s7, 256  }
 0x213   : > { %3906 = vsyncadd (%p5297_p11), %s4722_s7, 4294967040  ;;  %s874_s4 = scalar_lea.vmem [#allocation18], %s4754_s10 }
 0x214   : > { %3908 = dma.done.wait (%p5297_p11), %s4733_s25, 16  }
 0x215   : > { %3910 = vsyncadd (%p5297_p11), %s4733_s25, 4294967280  ;;  %s2859_s22 = sshll.u32 %s4754_s10, 5 }
 0x216   : > { %s4816_s20 = scalar_lea.vmem [#allocation19], %s2859_s22 }
 0x217   : > { %3912 = dma.done.wait (%p5297_p11), %s4722_s7, 512  }
 0x218   : > { %3914 = vsyncadd (%p5297_p11), %s4722_s7, 4294966784  ;;  %s891_s26 = scalar_lea.vmem [#allocation20], %s4754_s10 }
 0x219   : > { %3916 = dma.done.wait (%p5297_p11), %s4733_s25, 16  }
 0x21a   : > { %3918 = vsyncadd (%p5297_p11), %s4733_s25, 4294967280 }
 0x21b   : > { %3920 = dma.done.wait (%p5297_p11), %s4722_s7, 16  }
 0x21c   : > { %3922 = vsyncadd (%p5297_p11), %s4722_s7, 4294967280  ;;  %s907_s21 = scalar_lea.vmem [#allocation22], %s4754_s10 }
 0x21d   : > { %3924 = dma.done.wait (%p5297_p11), %s4733_s25, 16  }
 0x21e   : > { %3926 = vsyncadd (%p5297_p11), %s4733_s25, 4294967280  ;;  %s4847_s22 = scalar_lea.vmem [#allocation23], %s2853_s11  ;;  %s5298_s3 = sld [smem:[#allocation45_spill]] }
 0x224   : > { %p2861_p6 = scmp.ne.s32.totalorder %s5298_s3, 0 }
 0x225   : > { %v1021_v0 = vld [vmem:[%s4724_s1] sm:$0xff] (!%p2861_p6)  ;;  %vm1025_vm0 = vcmask (!%p2861_p6), 261120   ;;  %v1022_v1 = vld [vmem:[%s4724_s1 + $0x8] sm:$0xff] (!%p2861_p6) }
 0x226   : > { %1020 = sbr.rel (%p2861_p6) target bundleno = 868 (0x364), region = 152  ;;  %v1026_v2 = vsel (!%p2861_p6), %vm1025_vm0, %v1021_v0, 0.0  ;;  %v1029_v3 = vsel (!%p2861_p6), %vm1025_vm0, %v1022_v1, 0.0  ;;  %v2862_v21 = vld [vmem:[#allocation8] ss:$0 sm:$0xff] (!%p2861_p6) }
 0x227   : > { %1027 = vadd.xlane.f32.xlu0 (!%p2861_p6), %v1026_v2  ;;  %v2863_v23 = vld [vmem:[#allocation9] ss:$0 sm:$0xff] (!%p2861_p6) }
 0x22b   : > { %1030 = vadd.xlane.f32.xlu0 (!%p2861_p6), %v1029_v3 }
 0x2b4   : > { %v1028_v4 = vpop.xlane.xlu0 %1027 }
 0x2b5   : > { %v1033_v5 = vmul.f32 0.03125, %v1028_v4 }
 0x2b7   : > { %v1035_v6 = vsub.f32 %v1021_v0, %v1033_v5 }
 0x2b8   : > { %v1031_v7 = vpop.xlane.xlu0 %1030 }
 0x2b9   : > { %v1034_v8 = vmul.f32 0.03125, %v1031_v7  ;;  %v1037_v9 = vmul.f32 %v1035_v6, %v1035_v6 }
 0x2bb   : > { %v1036_v10 = vsub.f32 %v1022_v1, %v1034_v8  ;;  %v1039_v11 = vsel %vm1025_vm0, %v1037_v9, 0.0 }
 0x2bc   : > { %1040 = vadd.xlane.f32.xlu1 %v1039_v11 }
 0x2bd   : > { %v1038_v12 = vmul.f32 %v1036_v10, %v1036_v10 }
 0x2bf   : > { %v1042_v13 = vsel %vm1025_vm0, %v1038_v12, 0.0 }
 0x2c0   : > { %1043 = vadd.xlane.f32.xlu1 %v1042_v13 }
 0x349   : > { %v1041_v14 = vpop.xlane.xlu1 %1040 }
 0x34a   : > { %v1045_v15 = vmul.f32 0.03125, %v1041_v14 }
 0x34c   : > { %v1047_v16 = vadd.f32 1e-05, %v1045_v15 }
 0x34d   : > { %v1044_v17 = vpop.xlane.xlu1 %1043 }
 0x34e   : > { %3266 = vrsqrt.f32 %v1047_v16  ;;  %v1046_v18 = vmul.f32 0.03125, %v1044_v17 }
 0x350   : > { %v1048_v19 = vadd.f32 1e-05, %v1046_v18 }
 0x352   : > { %3268 = vrsqrt.f32 %v1048_v19 }
 0x358   : > { %v3267_v20 = vpop.eup %3266 }
 0x359   : > { %v1051_v22 = vmul.f32 %v3267_v20, %v1035_v6 }
 0x35b   : > { %v1059_v24 = vmul.f32 %v2862_v21, %v1051_v22 }
 0x35c   : > { %v3269_v25 = vpop.eup %3268 }
 0x35d   : > { %v1067_v26 = vadd.f32 %v2863_v23, %v1059_v24  ;;  %v1052_v27 = vmul.f32 %v3269_v25, %v1036_v10 }
 0x35f   : > { %1069 = vst.msk [vmem:[#allocation2] sm:$0xff] %vm1025_vm0, %v1067_v26  ;;  %v1060_v28 = vmul.f32 %v2862_v21, %v1052_v27 }
 0x361   : > { %v1068_v29 = vadd.f32 %v2863_v23, %v1060_v28 }
 0x363   : > { %1070 = vst.msk [vmem:[#allocation2 + $0x8] sm:$0xff] %vm1025_vm0, %v1068_v29 }
 0x364 PF: > { %v3285_v30 = vld [vmem:[%s816_s27] sm:$0xff]   ;;  %v3997_v31 = vmov 0.0   ;;  %v3286_v32 = vld [vmem:[%s816_s27 + $0x8] sm:$0xff]   ;;  %vm3998_vm1 = vmmov 0   ;;  %vm1111_vm2 = vcmask 261120   ;;  %s3999_s7 = smov 96  }
 0x365   : > { %2967 = vmatprep.subr.bf16.mxu0 %v3997_v31  ;;  %2975 = vmatprep.subr.bf16.mxu1 %v3997_v31  ;;  %v2866_v36 = vld [vmem:[%s824_s17] ss:$0 sm:$0xff]  ;;  %vm1161_vm3 = vcmask 64512   ;;  %v4900_v50 = vld [vmem:[%s4737_s16] ss:$0 sm:$0xff]  ;;  %s4000_s1 = smov 64  }
 0x366   : > { %2968 = vmatpush3.bf16.msra.mxu0 %v3285_v30  ;;  %2971 = vmatprep.mubr.msk.bf16.mxu0 %vm3998_vm1, %v3997_v31  ;;  %v4866_v33 = vld [vmem:[#allocation2] sm:$0xff]  ;;  %v4904_v57 = vld [vmem:[%s4737_s16 + $0x1] ss:$0 sm:$0xff]  ;;  %s4001_s11 = smov 88   ;;  %vm1290_vm4 = vcmask 1043456   ;;  %s4002_s25 = smov 120  }
 0x367   : > { %2969 = vmatprep.subr.bf16.mxu0 %v3997_v31  ;;  %2977 = vmatprep.mubr.msk.bf16.mxu1 %vm3998_vm1, %v3997_v31  ;;  %s4003_s16 = smov 56   ;;  %s4004_s5 = smov 80   ;;  %vm2080_vm5 = vcmask 130048   ;;  %vm2083_vm6 = vcmask 195584   ;;  %vm2363_vm9 = vcmask 523264  }
 0x368   : > { %s4005_s27 = smov 112   ;;  %s4006_s17 = smov 48  }
 0x369   : > { %s4007_s3 = smov 72   ;;  %s5299_s24 = scalar_lea.vmem [#allocation21], %s4754_s10 }
 0x36a   : > { %v4868_v34 = vld [vmem:[#allocation2 + $0x8] sm:$0xff]  ;;  %2970 = vmatpush3.bf16.msra.mxu0 %v3286_v32 }
 0x36b   : > { %v1087_v35 = vpack.c.bf16 %v4868_v34, %v4866_v33  ;;  %2981 = vmatprep.subr.bf16.mxu0 %v3997_v31 }
 0x36d   : > { %2972 = vmatmul.mubr.msk.bf16.vlgmr.msra.gmra.mrb[0].mxu0 %vm1111_vm2, %v1087_v35 }
 0x36e   : > { %2983 = vmatprep.mubr.msk.bf16.mxu0 %vm3998_vm1, %v3997_v31 }
 0x440   : > { %v1149_v37 = vpop.f32.mrb[0].mxu0 }
 0x441   : > { %v1150_v38 = vadd.f32 %v2866_v36, %v1149_v37  ;;  %v2973_v39 = vpop.f32.mrb[1].mxu0 }
 0x442   : > { %v1152_v40 = vpop.f32.mrb[2].mxu0 }
 0x443   : > { %v4881_v41 = vpack.c.bf16 %v1150_v38, %v1150_v38  ;;  %v1153_v42 = vadd.f32 %v2866_v36, %v1152_v40  ;;  %v2974_v43 = vpop.f32.mrb[3].mxu0 }
 0x445   : > { %1159 = vrot.lane.b32.xlu0 %v4881_v41, %s3999_s7  ;;  %v4884_v44 = vpack.c.bf16 %v1153_v42, %v1153_v42 }
 0x449   : > { %1209 = vrot.lane.b32.xlu0 %v4884_v44, %s3999_s7  ;;  %s4008_s7 = smov 104  }
 0x4b7   : > { %v1160_v45 = vpop.permute.xlu0 %1159 }
 0x4b8   : > { %v1166_v46 = vsel %vm1161_vm3, %v1160_v45, 0 }
 0x4b9   : > { %2976 = vmatpush3.bf16.xpose.msra.mxu1 %v1166_v46 }
 0x4ba   : > { %2987 = vmatprep.subr.bf16.mxu1 %v3997_v31 }
 0x4bb   : > { %v1210_v47 = vpop.permute.xlu0 %1209 }
 0x4bc   : > { %v1215_v48 = vsel %vm1161_vm3, %v1210_v47, 0 }
 0x4bd   : > { %2982 = vmatpush3.bf16.xpose.msra.mxu0 %v1215_v48 }
 0x4be   : > { %2993 = vmatprep.subr.bf16.mxu0 %v3997_v31 }
 0x4c0   : > { %2978 = vmatmul.mubr.msk.bf16.vlgmr.msra.gmra.mrb[0].mxu1 %vm1161_vm3, %v4881_v41 }
 0x4c1   : > { %2989 = vmatprep.mubr.msk.bf16.mxu1 %vm3998_vm1, %v3997_v31 }
 0x4c4   : > { %2984 = vmatmul.mubr.msk.bf16.vlgmr.msra.gmra.mrb[4].mxu0 %vm1161_vm3, %v4884_v44 }
 0x4c5   : > { %2995 = vmatprep.mubr.msk.bf16.mxu0 %vm3998_vm1, %v3997_v31 }
 0x593   : > { %v1202_v49 = vpop.f32.mrb[0].mxu1 }
 0x594   : > { %v1257_v51 = vmul.f32 0.35355338, %v1202_v49  ;;  %v2979_v52 = vpop.f32.mrb[1].mxu1 }
 0x595   : > { %v1205_v53 = vpop.f32.mrb[2].mxu1 }
 0x596   : > { %v2980_v54 = vpop.f32.mrb[3].mxu1  ;;  %v1259_v55 = vadd.f32 %v4900_v50, %v1257_v51 }
 0x597   : > { %v1251_v56 = vpop.f32.mrb[4].mxu0 }
 0x598   : > { %v1258_v58 = vmul.f32 0.35355338, %v1251_v56  ;;  %v2985_v59 = vpop.f32.mrb[5].mxu0  ;;  %v1261_v60 = vsel %vm1161_vm3, %v1259_v55, -inf }
 0x599   : > { %1262 = vmax.xlane.f32.xlu1 %v1261_v60  ;;  %v1254_v61 = vpop.f32.mrb[6].mxu0 }
 0x59a   : > { %v2986_v62 = vpop.f32.mrb[7].mxu0  ;;  %v1260_v63 = vadd.f32 %v4904_v57, %v1258_v58 }
 0x59c   : > { %v1264_v0 = vsel %vm1161_vm3, %v1260_v63, -inf }
 0x59d   : > { %1265 = vmax.xlane.f32.xlu1 %v1264_v0 }
 0x5ae   : > { %1285 = vrot.lane.b32.xlu1 %v4881_v41, %s4000_s1 }
 0x5b2   : > { %1334 = vrot.lane.b32.xlu1 %v4884_v44, %s4000_s1  ;;  %s4009_s1 = smov 40  }
 0x5b6   : > { %1384 = vrot.lane.b32.xlu1 %v4881_v41, %s4001_s11 }
 0x626   : > { %v1263_v1 = vpop.xlane.xlu1 %1262 }
 0x627   : > { %v1267_v2 = vsub.f32 %v1259_v55, %v1263_v1 }
 0x629   : > { %v1269_v3 = vmul.f32 1.442695, %v1267_v2 }
 0x62a   : > { %v1266_v4 = vpop.xlane.xlu1 %1265 }
 0x62b   : > { %3295 = vpow2.f32 %v1269_v3  ;;  %v1268_v5 = vsub.f32 %v1260_v63, %v1266_v4 }
 0x62d   : > { %v1271_v6 = vmul.f32 1.442695, %v1268_v5 }
 0x62e   : > { %v1286_v7 = vpop.permute.xlu1 %1285 }
 0x62f   : > { %3297 = vpow2.f32 %v1271_v6  ;;  %v1292_v8 = vsel %vm1290_vm4, %v1286_v7, 0 }
 0x630   : > { %2988 = vmatpush3.bf16.msra.mxu1 %v1292_v8 }
 0x631   : > { %2999 = vmatprep.subr.bf16.mxu1 %v3997_v31 }
 0x632   : > { %v1335_v9 = vpop.permute.xlu1 %1334 }
 0x633   : > { %v1340_v10 = vsel %vm1290_vm4, %v1335_v9, 0 }
 0x634   : > { %2994 = vmatpush3.bf16.msra.mxu0 %v1340_v10 }
 0x635   : > { %v3296_v11 = vpop.eup %3295  ;;  %3005 = vmatprep.subr.bf16.mxu0 %v3997_v31 }
 0x636   : > { %v1273_v12 = vsel %vm1161_vm3, %v3296_v11, 0.0  ;;  %v1385_v15 = vpop.permute.xlu1 %1384 }
 0x637   : > { %1274 = vadd.xlane.f32.xlu0 %v1273_v12  ;;  %v1390_v22 = vsel %vm1161_vm3, %v1385_v15, 0 }
 0x639   : > { %v3298_v13 = vpop.eup %3297 }
 0x63a   : > { %v1276_v14 = vsel %vm1161_vm3, %v3298_v13, 0.0 }
 0x63b   : > { %1277 = vadd.xlane.f32.xlu1 %v1276_v14 }
 0x64c   : > { %1434 = vrot.lane.b32.xlu1 %v4884_v44, %s4001_s11  ;;  %s4010_s11 = smov 8  }
 0x64d   : > { %1382 = vrot.lane.b32.xlu0 %v4881_v41, %s4002_s25 }
 0x650   : > { %1432 = vrot.lane.b32.xlu1 %v4884_v44, %s4002_s25  ;;  %s4011_s25 = smov 16  }
 0x6c4   : > { %v1275_v16 = vpop.xlane.xlu0 %1274 }
 0x6c5   : > { %3299 = vrcp.f32 %v1275_v16 }
 0x6c8   : > { %v1278_v17 = vpop.xlane.xlu1 %1277  ;;  %v1383_v27 = vpop.permute.xlu0 %1382 }
 0x6c9   : > { %3301 = vrcp.f32 %v1278_v17 }
 0x6cc   : > { %v1435_v24 = vpop.permute.xlu1 %1434 }
 0x6cd   : > { %v1440_v26 = vsel %vm1161_vm3, %v1435_v24, 0 }
 0x6cf   : > { %v3300_v18 = vpop.eup %3299 }
 0x6d0   : > { %v1280_v19 = vmul.f32 %v3300_v18, %v3296_v11  ;;  %v1433_v28 = vpop.permute.xlu1 %1432 }
 0x6d2   : > { %v1283_v20 = vpack.c.bf16 %v1280_v19, %v1280_v19 }
 0x6d3   : > { %v3302_v21 = vpop.eup %3301 }
 0x6d4   : > { %v1282_v23 = vmul.f32 %v3302_v21, %v3298_v13  ;;  %2990 = vmatmul.mubr.msk.bf16.vlgmr.msra.gmra.mrb[4].mxu1 %vm1161_vm3, %v1283_v20 }
 0x6d5   : > { %3000 = vmatpush3.bf16.xpose.msra.mxu1 %v1390_v22  ;;  %3001 = vmatprep.mubr.msk.bf16.mxu1 %vm3998_vm1, %v3997_v31 }
 0x6d6   : > { %v1284_v25 = vpack.c.bf16 %v1282_v23, %v1282_v23  ;;  %3011 = vmatprep.subr.bf16.mxu1 %v3997_v31 }
 0x6d8   : > { %2996 = vmatmul.mubr.msk.bf16.vlgmr.msra.gmra.mrb[8].mxu0 %vm1161_vm3, %v1284_v25 }
 0x6d9   : > { %3006 = vmatpush3.bf16.xpose.msra.mxu0 %v1440_v26  ;;  %3007 = vmatprep.mubr.msk.bf16.mxu0 %vm3998_vm1, %v3997_v31 }
 0x6da   : > { %3017 = vmatprep.subr.bf16.mxu0 %v3997_v31 }
 0x6dc   : > { %3002 = vmatmul.mubr.msk.bf16.vlgmr.msra.gmra.mrb[8].mxu1 %vm1161_vm3, %v1383_v27 }
 0x6dd   : > { %3013 = vmatprep.mubr.msk.bf16.mxu1 %vm3998_vm1, %v3997_v31 }
 0x6e0   : > { %3008 = vmatmul.mubr.msk.bf16.vlgmr.msra.gmra.mrb[12].mxu0 %vm1161_vm3, %v1433_v28 }
 0x6e1   : > { %3019 = vmatprep.mubr.msk.bf16.mxu0 %vm3998_vm1, %v3997_v31 }
 0x7a7   : > { %v4937_v29 = vpop.f32.mrb[4].mxu1 }
 0x7a8   : > { %v2991_v30 = vpop.f32.mrb[5].mxu1 }
 0x7a9   : > { %v1331_v32 = vpop.f32.mrb[6].mxu1 }
 0x7aa   : > { %v2992_v35 = vpop.f32.mrb[7].mxu1 }
 0x7ab   : > { %v4939_v36 = vpop.f32.mrb[8].mxu0 }
 0x7ac   : > { %v2997_v37 = vpop.f32.mrb[9].mxu0 }
 0x7ad   : > { %v1379_v38 = vpop.f32.mrb[10].mxu0 }
 0x7ae   : > { %v2998_v39 = vpop.f32.mrb[11].mxu0 }
 0x7af   : > { %v1426_v40 = vpop.f32.mrb[8].mxu1 }
 0x7b0   : > { %v1482_v42 = vmul.f32 0.35355338, %v1426_v40  ;;  %v3003_v43 = vpop.f32.mrb[9].mxu1 }
 0x7b1   : > { %v1429_v45 = vpop.f32.mrb[10].mxu1 }
 0x7b2   : > { %v3004_v46 = vpop.f32.mrb[11].mxu1  ;;  %v1484_v47 = vadd.f32 %v4900_v50, %v1482_v42 }
 0x7b3   : > { %v1476_v48 = vpop.f32.mrb[12].mxu0 }
 0x7b4   : > { %v1483_v49 = vmul.f32 0.35355338, %v1476_v48  ;;  %v3009_v51 = vpop.f32.mrb[13].mxu0  ;;  %v1486_v52 = vsel %vm1161_vm3, %v1484_v47, -inf }
 0x7b5   : > { %1487 = vmax.xlane.f32.xlu1 %v1486_v52  ;;  %v1479_v53 = vpop.f32.mrb[14].mxu0 }
 0x7b6   : > { %v3010_v54 = vpop.f32.mrb[15].mxu0  ;;  %v1485_v55 = vadd.f32 %v4904_v57, %v1483_v49 }
 0x7b8   : > { %v1489_v56 = vsel %vm1161_vm3, %v1485_v55, -inf }
 0x7b9   : > { %1490 = vmax.xlane.f32.xlu0 %v1489_v56 }
 0x7c6   : > { %1510 = vrot.lane.b32.xlu1 %v4881_v41, %s4003_s16 }
 0x7ca   : > { %1608 = vrot.lane.b32.xlu1 %v4881_v41, %s4004_s5 }
 0x7cf   : > { %1558 = vrot.lane.b32.xlu0 %v4884_v44, %s4003_s16  ;;  %s4012_s16 = smov 24  }
 0x7d3   : > { %1606 = vrot.lane.b32.xlu0 %v4881_v41, %s4005_s27 }
 0x842   : > { %v1488_v58 = vpop.xlane.xlu1 %1487 }
 0x843   : > { %v1492_v59 = vsub.f32 %v1484_v47, %v1488_v58 }
 0x845   : > { %v1494_v60 = vmul.f32 1.442695, %v1492_v59 }
 0x846   : > { %v1511_v61 = vpop.permute.xlu1 %1510  ;;  %v1491_v62 = vpop.xlane.xlu0 %1490 }
 0x847   : > { %3303 = vpow2.f32 %v1494_v60  ;;  %v1516_v63 = vsel %vm1290_vm4, %v1511_v61, 0  ;;  %v1493_v0 = vsub.f32 %v1485_v55, %v1491_v62 }
 0x848   : > { %3012 = vmatpush3.bf16.msra.mxu1 %v1516_v63 }
 0x849   : > { %v1496_v1 = vmul.f32 1.442695, %v1493_v0  ;;  %3023 = vmatprep.subr.bf16.mxu1 %v3997_v31 }
 0x84a   : > { %v1559_v2 = vpop.permute.xlu0 %1558  ;;  %v1609_v8 = vpop.permute.xlu1 %1608 }
 0x84b   : > { %3305 = vpow2.f32 %v1496_v1  ;;  %v1564_v3 = vsel %vm1290_vm4, %v1559_v2, 0  ;;  %v1614_v15 = vsel %vm1161_vm3, %v1609_v8, 0 }
 0x84c   : > { %3018 = vmatpush3.bf16.msra.mxu0 %v1564_v3 }
 0x84d   : > { %3029 = vmatprep.subr.bf16.mxu0 %v3997_v31 }
 0x84e   : > { %v1607_v20 = vpop.permute.xlu0 %1606 }
 0x851   : > { %v3304_v4 = vpop.eup %3303 }
 0x852   : > { %v1498_v5 = vsel %vm1161_vm3, %v3304_v4, 0.0 }
 0x853   : > { %1499 = vadd.xlane.f32.xlu1 %v1498_v5 }
 0x855   : > { %v3306_v6 = vpop.eup %3305 }
 0x856   : > { %v1501_v7 = vsel %vm1161_vm3, %v3306_v6, 0.0 }
 0x857   : > { %1502 = vadd.xlane.f32.xlu1 %v1501_v7 }
 0x868   : > { %1658 = vrot.lane.b32.xlu1 %v4884_v44, %s4004_s5 }
 0x86c   : > { %1656 = vrot.lane.b32.xlu1 %v4884_v44, %s4005_s27 }
 0x8e0   : > { %v1500_v9 = vpop.xlane.xlu1 %1499 }
 0x8e1   : > { %3307 = vrcp.f32 %v1500_v9 }
 0x8e4   : > { %v1503_v10 = vpop.xlane.xlu1 %1502 }
 0x8e5   : > { %3309 = vrcp.f32 %v1503_v10 }
 0x8e8   : > { %v1659_v17 = vpop.permute.xlu1 %1658 }
 0x8e9   : > { %v1664_v19 = vsel %vm1161_vm3, %v1659_v17, 0 }
 0x8eb   : > { %v3308_v11 = vpop.eup %3307 }
 0x8ec   : > { %v1505_v12 = vmul.f32 %v3308_v11, %v3304_v4  ;;  %v1657_v21 = vpop.permute.xlu1 %1656 }
 0x8ee   : > { %v1508_v13 = vpack.c.bf16 %v1505_v12, %v1505_v12 }
 0x8ef   : > { %v3310_v14 = vpop.eup %3309 }
 0x8f0   : > { %v1507_v16 = vmul.f32 %v3310_v14, %v3306_v6  ;;  %3014 = vmatmul.mubr.msk.bf16.vlgmr.msra.gmra.mrb[12].mxu1 %vm1161_vm3, %v1508_v13 }
 0x8f1   : > { %3024 = vmatpush3.bf16.xpose.msra.mxu1 %v1614_v15  ;;  %3025 = vmatprep.mubr.msk.bf16.mxu1 %vm3998_vm1, %v3997_v31 }
 0x8f2   : > { %v1509_v18 = vpack.c.bf16 %v1507_v16, %v1507_v16  ;;  %3035 = vmatprep.subr.bf16.mxu1 %v3997_v31 }
 0x8f4   : > { %3020 = vmatmul.mubr.msk.bf16.vlgmr.msra.gmra.mrb[16].mxu0 %vm1161_vm3, %v1509_v18 }
 0x8f5   : > { %3030 = vmatpush3.bf16.xpose.msra.mxu0 %v1664_v19  ;;  %3031 = vmatprep.mubr.msk.bf16.mxu0 %vm3998_vm1, %v3997_v31 }
 0x8f6   : > { %3041 = vmatprep.subr.bf16.mxu0 %v3997_v31 }
 0x8f8   : > { %3026 = vmatmul.mubr.msk.bf16.vlgmr.msra.gmra.mrb[16].mxu1 %vm1161_vm3, %v1607_v20 }
 0x8f9   : > { %3037 = vmatprep.mubr.msk.bf16.mxu1 %vm3998_vm1, %v3997_v31 }
 0x8fc   : > { %3032 = vmatmul.mubr.msk.bf16.vlgmr.msra.gmra.mrb[20].mxu0 %vm1161_vm3, %v1657_v21 }
 0x8fd   : > { %3043 = vmatprep.mubr.msk.bf16.mxu0 %vm3998_vm1, %v3997_v31 }
 0x9c3   : > { %v4973_v22 = vpop.f32.mrb[12].mxu1 }
 0x9c4   : > { %v3015_v23 = vpop.f32.mrb[13].mxu1 }
 0x9c5   : > { %v1555_v24 = vpop.f32.mrb[14].mxu1 }
 0x9c6   : > { %v3016_v25 = vpop.f32.mrb[15].mxu1 }
 0x9c7   : > { %v4975_v26 = vpop.f32.mrb[16].mxu0 }
 0x9c8   : > { %v3270_v27 = vpack.i.bf16 %v4975_v26, %v4973_v22  ;;  %v3021_v28 = vpop.f32.mrb[17].mxu0 }
 0x9c9   : > { %v1603_v30 = vpop.f32.mrb[18].mxu0 }
 0x9ca   : > { %v3022_v32 = vpop.f32.mrb[19].mxu0 }
 0x9cb   : > { %v1650_v35 = vpop.f32.mrb[16].mxu1 }
 0x9cc   : > { %v1706_v37 = vmul.f32 0.35355338, %v1650_v35  ;;  %v3027_v38 = vpop.f32.mrb[17].mxu1 }
 0x9cd   : > { %v1653_v39 = vpop.f32.mrb[18].mxu1 }
 0x9ce   : > { %v3028_v40 = vpop.f32.mrb[19].mxu1  ;;  %v1708_v42 = vadd.f32 %v4900_v50, %v1706_v37 }
 0x9cf   : > { %v1700_v43 = vpop.f32.mrb[20].mxu0 }
 0x9d0   : > { %v1707_v45 = vmul.f32 0.35355338, %v1700_v43  ;;  %v3033_v46 = vpop.f32.mrb[21].mxu0  ;;  %v1710_v47 = vsel %vm1161_vm3, %v1708_v42, -inf }
 0x9d1   : > { %1711 = vmax.xlane.f32.xlu0 %v1710_v47  ;;  %v1703_v48 = vpop.f32.mrb[22].mxu0 }
 0x9d2   : > { %v3034_v49 = vpop.f32.mrb[23].mxu0  ;;  %v1709_v51 = vadd.f32 %v4904_v57, %v1707_v45 }
 0x9d4   : > { %v1713_v52 = vsel %vm1161_vm3, %v1709_v51, -inf }
 0x9d5   : > { %1714 = vmax.xlane.f32.xlu1 %v1713_v52 }
 0x9e6   : > { %1734 = vrot.lane.b32.xlu1 %v4881_v41, %s4006_s17 }
 0x9ea   : > { %1832 = vrot.lane.b32.xlu1 %v4881_v41, %s4007_s3 }
 0x9ee   : > { %1882 = vrot.lane.b32.xlu1 %v4884_v44, %s4007_s3 }
 0x9f2   : > { %1880 = vrot.lane.b32.xlu1 %v4884_v44, %s4008_s7 }
 0xa5e   : > { %v1712_v53 = vpop.xlane.xlu0 %1711 }
 0xa5f   : > { %v1716_v54 = vsub.f32 %v1708_v42, %v1712_v53 }
 0xa61   : > { %v1718_v55 = vmul.f32 1.442695, %v1716_v54 }
 0xa62   : > { %v1715_v56 = vpop.xlane.xlu1 %1714 }
 0xa63   : > { %3311 = vpow2.f32 %v1718_v55  ;;  %v1717_v58 = vsub.f32 %v1709_v51, %v1715_v56 }
 0xa65   : > { %v1720_v59 = vmul.f32 1.442695, %v1717_v58 }
 0xa66   : > { %v1735_v60 = vpop.permute.xlu1 %1734 }
 0xa67   : > { %3313 = vpow2.f32 %v1720_v59  ;;  %v1740_v61 = vsel %vm1290_vm4, %v1735_v60, 0 }
 0xa68   : > { %3036 = vmatpush3.bf16.msra.mxu1 %v1740_v61 }
 0xa69   : > { %3047 = vmatprep.subr.bf16.mxu1 %v3997_v31 }
 0xa6a   : > { %v1833_v7 = vpop.permute.xlu1 %1832 }
 0xa6b   : > { %v1838_v11 = vsel %vm1161_vm3, %v1833_v7, 0 }
 0xa6d   : > { %v3312_v62 = vpop.eup %3311 }
 0xa6e   : > { %v1722_v63 = vsel %vm1161_vm3, %v3312_v62, 0.0  ;;  %v1883_v13 = vpop.permute.xlu1 %1882 }
 0xa6f   : > { %1723 = vadd.xlane.f32.xlu0 %v1722_v63  ;;  %v1888_v15 = vsel %vm1161_vm3, %v1883_v13, 0 }
 0xa71   : > { %v3314_v0 = vpop.eup %3313 }
 0xa72   : > { %v1725_v1 = vsel %vm1161_vm3, %v3314_v0, 0.0  ;;  %v1881_v17 = vpop.permute.xlu1 %1880 }
 0xa73   : > { %1726 = vadd.xlane.f32.xlu0 %v1725_v1 }
 0xa89   : > { %1782 = vrot.lane.b32.xlu0 %v4884_v44, %s4006_s17 }
 0xa8d   : > { %1830 = vrot.lane.b32.xlu0 %v4881_v41, %s4008_s7 }
 0xafc   : > { %v1724_v2 = vpop.xlane.xlu0 %1723 }
 0xafd   : > { %3315 = vrcp.f32 %v1724_v2 }
 0xb00   : > { %v1727_v3 = vpop.xlane.xlu0 %1726 }
 0xb01   : > { %3317 = vrcp.f32 %v1727_v3 }
 0xb04   : > { %v1783_v4 = vpop.permute.xlu0 %1782 }
 0xb05   : > { %v1788_v5 = vsel %vm1290_vm4, %v1783_v4, 0  ;;  %v3287_v4 = vld [vmem:[%s833_s28] sm:$0xff]  }
 0xb06   : > { %3042 = vmatpush3.bf16.msra.mxu0 %v1788_v5  ;;  %v3288_v5 = vld [vmem:[%s833_s28 + $0x8] sm:$0xff]   ;;  %s5300_s28 = sld [smem:[#allocation45_spill]] }
 0xb07   : > { %v3316_v6 = vpop.eup %3315  ;;  %3053 = vmatprep.subr.bf16.mxu0 %v3997_v31 }
 0xb08   : > { %v1729_v8 = vmul.f32 %v3316_v6, %v3312_v62  ;;  %v1831_v16 = vpop.permute.xlu0 %1830 }
 0xb0a   : > { %v1732_v9 = vpack.c.bf16 %v1729_v8, %v1729_v8 }
 0xb0b   : > { %v3318_v10 = vpop.eup %3317 }
 0xb0c   : > { %v1731_v12 = vmul.f32 %v3318_v10, %v3314_v0  ;;  %3038 = vmatmul.mubr.msk.bf16.vlgmr.msra.gmra.mrb[20].mxu1 %vm1161_vm3, %v1732_v9  ;;  %p2908_p5 = scmp.ne.s32.totalorder %s5300_s28, 1 }
 0xb0d   : > { %3048 = vmatpush3.bf16.xpose.msra.mxu1 %v1838_v11  ;;  %3049 = vmatprep.mubr.msk.bf16.mxu1 %vm3998_vm1, %v3997_v31  ;;  %vm2460_vm10 = vcmask (!%p2908_p5), 253952  }
 0xb0e   : > { %v1733_v14 = vpack.c.bf16 %v1731_v12, %v1731_v12  ;;  %3059 = vmatprep.subr.bf16.mxu1 %v3997_v31 }
 0xb10   : > { %3044 = vmatmul.mubr.msk.bf16.vlgmr.msra.gmra.mrb[24].mxu0 %vm1161_vm3, %v1733_v14 }
 0xb11   : > { %3054 = vmatpush3.bf16.xpose.msra.mxu0 %v1888_v15  ;;  %3055 = vmatprep.mubr.msk.bf16.mxu0 %vm3998_vm1, %v3997_v31 }
 0xb12   : > { %3065 = vmatprep.subr.bf16.mxu0 %v3997_v31 }
 0xb14   : > { %3050 = vmatmul.mubr.msk.bf16.vlgmr.msra.gmra.mrb[24].mxu1 %vm1161_vm3, %v1831_v16 }
 0xb15   : > { %3061 = vmatprep.mubr.msk.bf16.mxu1 %vm3998_vm1, %v3997_v31 }
 0xb18   : > { %3056 = vmatmul.mubr.msk.bf16.vlgmr.msra.gmra.mrb[28].mxu0 %vm1161_vm3, %v1881_v17 }
 0xb19   : > { %3067 = vmatprep.mubr.msk.bf16.mxu0 %vm3998_vm1, %v3997_v31 }
 0xbdf   : > { %v1776_v18 = vpop.f32.mrb[20].mxu1 }
 0xbe0   : > { %v3039_v19 = vpop.f32.mrb[21].mxu1 }
 0xbe1   : > { %v1779_v20 = vpop.f32.mrb[22].mxu1 }
 0xbe2   : > { %v3040_v21 = vpop.f32.mrb[23].mxu1 }
 0xbe3   : > { %v1824_v23 = vpop.f32.mrb[24].mxu0 }
 0xbe4   : > { %v3275_v24 = vpack.i.bf16 %v1824_v23, %v1776_v18  ;;  %v3045_v25 = vpop.f32.mrb[25].mxu0 }
 0xbe5   : > { %v1827_v28 = vpop.f32.mrb[26].mxu0 }
 0xbe6   : > { %v3046_v30 = vpop.f32.mrb[27].mxu0 }
 0xbe7   : > { %v1874_v32 = vpop.f32.mrb[24].mxu1 }
 0xbe8   : > { %v1930_v35 = vmul.f32 0.35355338, %v1874_v32  ;;  %v3051_v37 = vpop.f32.mrb[25].mxu1 }
 0xbe9   : > { %v1877_v38 = vpop.f32.mrb[26].mxu1 }
 0xbea   : > { %v3052_v39 = vpop.f32.mrb[27].mxu1  ;;  %v1932_v40 = vadd.f32 %v4900_v50, %v1930_v35 }
 0xbeb   : > { %v1924_v42 = vpop.f32.mrb[28].mxu0  ;;  %v2886_v39 = vld [vmem:[%s841_s2] ss:$0 sm:$0xff] }
 0xbec   : > { %v1931_v43 = vmul.f32 0.35355338, %v1924_v42  ;;  %v3057_v45 = vpop.f32.mrb[29].mxu0  ;;  %v1934_v46 = vsel %vm1161_vm3, %v1932_v40, -inf }
 0xbed   : > { %1935 = vmax.xlane.f32.xlu0 %v1934_v46  ;;  %v1927_v47 = vpop.f32.mrb[30].mxu0 }
 0xbee   : > { %v3058_v48 = vpop.f32.mrb[31].mxu0  ;;  %v1933_v49 = vadd.f32 %v4904_v57, %v1931_v43 }
 0xbf0   : > { %v1937_v51 = vsel %vm1161_vm3, %v1933_v49, -inf }
 0xbf1   : > { %1938 = vmax.xlane.f32.xlu1 %v1937_v51 }
 0xc02   : > { %1958 = vrot.lane.b32.xlu1 %v4881_v41, %s4009_s1 }
 0xc06   : > { %3271 = vrot.lane.b32.xlu1 %v3270_v27, %s4010_s11 }
 0xc0a   : > { %3276 = vrot.lane.b32.xlu1 %v3275_v24, %s4011_s25 }
 0xc7a   : > { %v1936_v50 = vpop.xlane.xlu0 %1935 }
 0xc7b   : > { %v1940_v52 = vsub.f32 %v1932_v40, %v1936_v50 }
 0xc7d   : > { %v1942_v53 = vmul.f32 1.442695, %v1940_v52 }
 0xc7e   : > { %v1939_v54 = vpop.xlane.xlu1 %1938 }
 0xc7f   : > { %3319 = vpow2.f32 %v1942_v53  ;;  %v1941_v57 = vsub.f32 %v1933_v49, %v1939_v54 }
 0xc81   : > { %v1944_v55 = vmul.f32 1.442695, %v1941_v57 }
 0xc82   : > { %v1959_v56 = vpop.permute.xlu1 %1958 }
 0xc83   : > { %3321 = vpow2.f32 %v1944_v55  ;;  %v1964_v58 = vsel %vm1290_vm4, %v1959_v56, 0 }
 0xc84   : > { %3060 = vmatpush3.bf16.msra.mxu1 %v1964_v58 }
 0xc85   : > { %3071 = vmatprep.subr.bf16.mxu1 %v3997_v31 }
 0xc86   : > { %v3272_v15 = vpop.permute.xlu1 %3271 }
 0xc87   : > { %v3274_v17 = vunpack.i.h.bf16 %v3272_v15  ;;  %v3273_v18 = vunpack.i.l.bf16 %v3272_v15 }
 0xc89   : > { %v3320_v41 = vpop.eup %3319  ;;  %v2079_v23 = vsel %vm1161_vm3, %v4939_v36, %v3274_v17  ;;  %v2078_v24 = vsel %vm1161_vm3, %v4937_v29, %v3273_v18 }
 0xc8a   : > { %v1946_v22 = vsel %vm1161_vm3, %v3320_v41, 0.0  ;;  %v3277_v16 = vpop.permute.xlu1 %3276 }
 0xc8b   : > { %1947 = vadd.xlane.f32.xlu0 %v1946_v22  ;;  %v3279_v19 = vunpack.i.h.bf16 %v3277_v16  ;;  %v3278_v20 = vunpack.i.l.bf16 %v3277_v16 }
 0xc8d   : > { %v3322_v26 = vpop.eup %3321  ;;  %v2081_v30 = vsel %vm2080_vm5, %v2078_v24, %v3278_v20  ;;  %v2082_v32 = vsel %vm2080_vm5, %v2079_v23, %v3279_v19 }
 0xc8e   : > { %v1949_v27 = vsel %vm1161_vm3, %v3322_v26, 0.0 }
 0xc8f   : > { %1950 = vadd.xlane.f32.xlu0 %v1949_v27 }
 0xca5   : > { %2006 = vrot.lane.b32.xlu0 %v4884_v44, %s4009_s1 }
 0xd18   : > { %v1948_v59 = vpop.xlane.xlu0 %1947 }
 0xd19   : > { %3323 = vrcp.f32 %v1948_v59 }
 0xd1c   : > { %v1951_v60 = vpop.xlane.xlu0 %1950 }
 0xd1d   : > { %3325 = vrcp.f32 %v1951_v60 }
 0xd20   : > { %v2007_v61 = vpop.permute.xlu0 %2006 }
 0xd21   : > { %v2012_v62 = vsel %vm1290_vm4, %v2007_v61, 0 }
 0xd22   : > { %3066 = vmatpush3.bf16.msra.mxu0 %v2012_v62 }
 0xd23   : > { %v3324_v63 = vpop.eup %3323  ;;  %3079 = vmatprep.subr.bf16.mxu0 %v3997_v31 }
 0xd24   : > { %v1953_v0 = vmul.f32 %v3324_v63, %v3320_v41  ;;  %v3290_v41 = vld [vmem:[%s866_s6 + $0x8] sm:$0xff]   ;;  %v2890_v63 = vld [vmem:[%s849_s19] ss:$0 sm:$0xff] }
 0xd26   : > { %v1956_v1 = vpack.c.bf16 %v1953_v0, %v1953_v0 }
 0xd27   : > { %v3326_v2 = vpop.eup %3325 }
 0xd28   : > { %v1955_v3 = vmul.f32 %v3326_v2, %v3322_v26  ;;  %3062 = vmatmul.mubr.msk.bf16.vlgmr.msra.gmra.mrb[28].mxu1 %vm1161_vm3, %v1956_v1 }
 0xd29   : > { %3075 = vmatprep.mubr.msk.bf16.mxu1 %vm3998_vm1, %v3997_v31  ;;  %3072 = vmatpush3.bf16.msra.mxu1 %v3287_v4 }
 0xd2a   : > { %v1957_v44 = vpack.c.bf16 %v1955_v3, %v1955_v3  ;;  %3073 = vmatprep.subr.bf16.mxu1 %v3997_v31 }
 0xd2c   : > { %3068 = vmatmul.mubr.msk.bf16.vlgmr.msra.gmra.mrb[32].mxu0 %vm1161_vm3, %v1957_v44  ;;  %v2891_v44 = vld [vmem:[%s857_s14] ss:$0 sm:$0xff] }
 0xd2d   : > { %3083 = vmatprep.mubr.msk.bf16.mxu0 %vm3998_vm1, %v3997_v31  ;;  %3074 = vmatpush3.bf16.msra.mxu1 %v3288_v5 }
 0xd2e   : > { %3087 = vmatprep.subr.bf16.mxu1 %v3997_v31 }
 0xdfb   : > { %v2000_v6 = vpop.f32.mrb[28].mxu1 }
 0xdfc   : > { %v3063_v7 = vpop.f32.mrb[29].mxu1 }
 0xdfd   : > { %v2003_v8 = vpop.f32.mrb[30].mxu1 }
 0xdfe   : > { %v3064_v9 = vpop.f32.mrb[31].mxu1  ;;  %v3291_v8 = vld [vmem:[%s4816_s20] sm:$0xff]  }
 0xdff   : > { %v2048_v10 = vpop.f32.mrb[32].mxu0  ;;  %v3292_v9 = vld [vmem:[%s4816_s20 + $0x8] sm:$0xff]  }
 0xe00   : > { %v3280_v11 = vpack.i.bf16 %v2048_v10, %v2000_v6  ;;  %v3069_v12 = vpop.f32.mrb[33].mxu0  ;;  %v3293_v10 = vld [vmem:[%s4816_s20 + $0x10] sm:$0xff]  }
 0xe01   : > { %v2051_v13 = vpop.f32.mrb[34].mxu0  ;;  %v2892_v12 = vld [vmem:[%s874_s4] ss:$0 sm:$0xff] }
 0xe02   : > { %3281 = vrot.lane.b32.xlu0 %v3280_v11, %s4012_s16  ;;  %v3070_v14 = vpop.f32.mrb[35].mxu0  ;;  %v3294_v11 = vld [vmem:[%s4816_s20 + $0x18] sm:$0xff]  }
 0xe74   : > { %v3282_v21 = vpop.permute.xlu0 %3281 }
 0xe75   : > { %v3284_v25 = vunpack.i.h.bf16 %v3282_v21  ;;  %v3283_v28 = vunpack.i.l.bf16 %v3282_v21 }
 0xe77   : > { %v2085_v35 = vsel %vm2083_vm6, %v2082_v32, %v3284_v25  ;;  %v2084_v37 = vsel %vm2083_vm6, %v2081_v30, %v3283_v28 }
 0xe78   : > { %v2086_v38 = vpack.c.bf16 %v2085_v35, %v2084_v37 }
 0xe7a   : > { %3076 = vmatmul.mubr.msk.bf16.vlgmr.msra.gmra.mrb[32].mxu1 %vm1111_vm2, %v2086_v38 }
 0xe7b   : > { %3095 = vmatprep.mubr.msk.bf16.mxu1 %vm3998_vm1, %v3997_v31  ;;  %3088 = vmatpush3.bf16.msra.mxu1 %v3291_v8  ;;  %v2900_v8 = vld [vmem:[%s891_s26] ss:$0 sm:$0xff] }
 0xe7c   : > { %3089 = vmatprep.subr.bf16.mxu1 %v3997_v31 }
 0xe7f   : > { %3090 = vmatpush3.bf16.msra.mxu1 %v3292_v9 }
 0xe80   : > { %3091 = vmatprep.subr.bf16.mxu1 %v3997_v31 }
 0xe83   : > { %3092 = vmatpush3.bf16.msra.mxu1 %v3293_v10 }
 0xe84   : > { %3093 = vmatprep.subr.bf16.mxu1 %v3997_v31 }
 0xe87   : > { %3094 = vmatpush3.bf16.msra.mxu1 %v3294_v11 }
 0xf4d   : > { %v2147_v40 = vpop.f32.mrb[32].mxu1 }
 0xf4e   : > { %v2148_v42 = vadd.f32 %v2886_v39, %v2147_v40  ;;  %v3077_v36 = vpop.f32.mrb[33].mxu1 }
 0xf4f   : > { %v2150_v43 = vpop.f32.mrb[34].mxu1 }
 0xf50   : > { %v2151_v45 = vadd.f32 %v2886_v39, %v2150_v43  ;;  %v3078_v29 = vpop.f32.mrb[35].mxu1  ;;  %v2154_v46 = vadd.f32 %v2148_v42, %v4866_v33 }
 0xf52   : > { %v2158_v47 = vsel %vm1111_vm2, %v2154_v46, 0.0  ;;  %v2155_v48 = vadd.f32 %v2151_v45, %v4868_v34  ;;  %v3289_v34 = vld [vmem:[%s866_s6] sm:$0xff]  }
 0xf53   : > { %2159 = vadd.xlane.f32.xlu1 %v2158_v47  ;;  %3080 = vmatpush3.bf16.msra.mxu0 %v3289_v34 }
 0xf54   : > { %v2161_v49 = vsel %vm1111_vm2, %v2155_v48, 0.0  ;;  %3081 = vmatprep.subr.bf16.mxu0 %v3997_v31 }
 0xf55   : > { %2162 = vadd.xlane.f32.xlu0 %v2161_v49 }
 0xf57   : > { %3082 = vmatpush3.bf16.msra.mxu0 %v3290_v41 }
 0xfe0   : > { %v2160_v51 = vpop.xlane.xlu1 %2159 }
 0xfe1   : > { %v2165_v50 = vmul.f32 0.03125, %v2160_v51 }
 0xfe2   : > { %v2163_v52 = vpop.xlane.xlu0 %2162 }
 0xfe3   : > { %v2167_v53 = vsub.f32 %v2154_v46, %v2165_v50  ;;  %v2166_v54 = vmul.f32 0.03125, %v2163_v52 }
 0xfe5   : > { %v2168_v57 = vsub.f32 %v2155_v48, %v2166_v54  ;;  %v2169_v55 = vmul.f32 %v2167_v53, %v2167_v53 }
 0xfe7   : > { %v2171_v56 = vsel %vm1111_vm2, %v2169_v55, 0.0  ;;  %v2170_v33 = vmul.f32 %v2168_v57, %v2168_v57 }
 0xfe8   : > { %2172 = vadd.xlane.f32.xlu0 %v2171_v56 }
 0xfe9   : > { %v2174_v58 = vsel %vm1111_vm2, %v2170_v33, 0.0 }
 0xfea   : > { %2175 = vadd.xlane.f32.xlu1 %v2174_v58 }
0x1075   : > { %v2173_v22 = vpop.xlane.xlu0 %2172 }
0x1076   : > { %v2177_v26 = vmul.f32 0.03125, %v2173_v22 }
0x1077   : > { %v2176_v27 = vpop.xlane.xlu1 %2175 }
0x1078   : > { %v2179_v59 = vadd.f32 1e-05, %v2177_v26  ;;  %v2178_v60 = vmul.f32 0.03125, %v2176_v27 }
0x107a   : > { %3327 = vrsqrt.f32 %v2179_v59  ;;  %v2180_v61 = vadd.f32 1e-05, %v2178_v60 }
0x107c   : > { %3329 = vrsqrt.f32 %v2180_v61 }
0x1084   : > { %v3328_v62 = vpop.eup %3327 }
0x1085   : > { %v2183_v0 = vmul.f32 %v3328_v62, %v2167_v53 }
0x1086   : > { %v3330_v1 = vpop.eup %3329 }
0x1087   : > { %v2191_v2 = vmul.f32 %v2890_v63, %v2183_v0  ;;  %v2184_v3 = vmul.f32 %v3330_v1, %v2168_v57 }
0x1089   : > { %v2192_v4 = vmul.f32 %v2890_v63, %v2184_v3  ;;  %v5063_v5 = vadd.f32 %v2891_v44, %v2191_v2 }
0x108b   : > { %v5065_v6 = vadd.f32 %v2891_v44, %v2192_v4 }
0x108d   : > { %v2201_v7 = vpack.c.bf16 %v5065_v6, %v5063_v5 }
0x108f   : > { %3084 = vmatmul.mubr.msk.bf16.vlgmr.msra.gmra.mrb[36].mxu0 %vm1111_vm2, %v2201_v7 }
0x1162   : > { %v2262_v13 = vpop.f32.mrb[36].mxu0 }
0x1163   : > { %v2263_v14 = vadd.f32 %v2892_v12, %v2262_v13  ;;  %v3085_v15 = vpop.f32.mrb[37].mxu0 }
0x1164   : > { %v2265_v16 = vpop.f32.mrb[38].mxu0 }
0x1165   : > { %v2269_v17 = vmul.f32 0.70710677, %v2263_v14  ;;  %v2266_v18 = vadd.f32 %v2892_v12, %v2265_v16  ;;  %v3086_v19 = vpop.f32.mrb[39].mxu0  ;;  %v2317_v1 = vmul.f32 0.5, %v2263_v14 }
0x1167   : > { %v2271_v20 = vand.u32 2147483647, %v2269_v17  ;;  %v2270_v21 = vmul.f32 0.70710677, %v2266_v18  ;;  %vm2311_vm7 = vcmp.ge.f32.partialorder %v2269_v17, 0.0  ;;  %v2318_v2 = vmul.f32 0.5, %v2266_v18 }
0x1169   : > { %v2273_v23 = vmul.f32 0.3275911, %v2271_v20  ;;  %v2272_v24 = vand.u32 2147483647, %v2270_v21  ;;  %v2299_v31 = vsub.f32 0.0, %v2271_v20  ;;  %vm2312_vm8 = vcmp.ge.f32.partialorder %v2270_v21, 0.0 }
0x116b   : > { %v2275_v25 = vadd.f32 1.0, %v2273_v23  ;;  %v2274_v28 = vmul.f32 0.3275911, %v2272_v24  ;;  %v2300_v32 = vsub.f32 0.0, %v2272_v24  ;;  %v2301_v37 = vmul.f32 %v2299_v31, %v2271_v20 }
0x116d   : > { %3331 = vrcp.f32 %v2275_v25  ;;  %v2276_v30 = vadd.f32 1.0, %v2274_v28  ;;  %v2302_v42 = vmul.f32 %v2300_v32, %v2272_v24  ;;  %v2303_v36 = vmul.f32 1.442695, %v2301_v37 }
0x116f   : > { %3333 = vrcp.f32 %v2276_v30  ;;  %v2305_v47 = vmul.f32 1.442695, %v2302_v42  ;;  %v2906_v42 = vld [vmem:[%s5299_s24] ss:$0 sm:$0xff] }
0x1170   : > { %3335 = vpow2.f32 %v2303_v36 }
0x1171   : > { %3337 = vpow2.f32 %v2305_v47 }
0x1177   : > { %v3332_v35 = vpop.eup %3331 }
0x1178   : > { %v2281_v38 = vmul.f32 1.0614054, %v3332_v35 }
0x1179   : > { %v3334_v39 = vpop.eup %3333 }
0x117a   : > { %v2896_v40 = vadd.f32 -1.4531521, %v2281_v38  ;;  %v2282_v43 = vmul.f32 1.0614054, %v3334_v39  ;;  %v3336_v33 = vpop.eup %3335 }
0x117b   : > { %v3338_v22 = vpop.eup %3337 }
0x117c   : > { %v2285_v45 = vmul.f32 %v3332_v35, %v2896_v40  ;;  %v2897_v29 = vadd.f32 -1.4531521, %v2282_v43 }
0x117e   : > { %v2287_v46 = vadd.f32 1.4214138, %v2285_v45  ;;  %v2286_v48 = vmul.f32 %v3334_v39, %v2897_v29  ;;  %v2907_v45 = vld [vmem:[%s907_s21] ss:$0 sm:$0xff] }
0x1180   : > { %v2289_v49 = vmul.f32 %v3332_v35, %v2287_v46  ;;  %v2288_v51 = vadd.f32 1.4214138, %v2286_v48 }
0x1182   : > { %v2898_v50 = vadd.f32 -0.28449672, %v2289_v49  ;;  %v2290_v52 = vmul.f32 %v3334_v39, %v2288_v51 }
0x1184   : > { %v2293_v53 = vmul.f32 %v3332_v35, %v2898_v50  ;;  %v2899_v54 = vadd.f32 -0.28449672, %v2290_v52 }
0x1186   : > { %v2295_v57 = vadd.f32 0.2548296, %v2293_v53  ;;  %v2294_v55 = vmul.f32 %v3334_v39, %v2899_v54 }
0x1188   : > { %v2297_v56 = vmul.f32 %v3332_v35, %v2295_v57  ;;  %v2296_v58 = vadd.f32 0.2548296, %v2294_v55 }
0x118a   : > { %v2307_v34 = vmul.f32 %v3336_v33, %v2297_v56  ;;  %v2298_v41 = vmul.f32 %v3334_v39, %v2296_v58 }
0x118c   : > { %v2309_v26 = vsub.f32 1.0, %v2307_v34  ;;  %v2308_v27 = vmul.f32 %v3338_v22, %v2298_v41 }
0x118e   : > { %v2313_v59 = vsub.f32 0.0, %v2309_v26  ;;  %v2310_v60 = vsub.f32 1.0, %v2308_v27 }
0x1190   : > { %v2315_v61 = vsel %vm2311_vm7, %v2309_v26, %v2313_v59  ;;  %v2314_v62 = vsub.f32 0.0, %v2310_v60 }
0x1191   : > { %v2319_v63 = vadd.f32 1.0, %v2315_v61 }
0x1192   : > { %v2316_v0 = vsel %vm2312_vm8, %v2310_v60, %v2314_v62 }
0x1193   : > { %v2320_v3 = vadd.f32 1.0, %v2316_v0  ;;  %v2321_v44 = vmul.f32 %v2319_v63, %v2317_v1 }
0x1195   : > { %v2322_v4 = vmul.f32 %v2320_v3, %v2318_v2 }
0x1197   : > { %v2323_v7 = vpack.c.bf16 %v2322_v4, %v2321_v44 }
0x1199   : > { %3096 = vmatmul.mubr.msk.bf16.vlgmr.msra.gmra.mrb[36].mxu1 %vm2363_vm9, %v2323_v7 }
0x126c   : > { %v2401_v9 = vpop.f32.mrb[36].mxu1 }
0x126d   : > { %v2402_v10 = vadd.f32 %v2900_v8, %v2401_v9  ;;  %v3097_v11 = vpop.f32.mrb[37].mxu1 }
0x126e   : > { %v2404_v12 = vpop.f32.mrb[38].mxu1 }
0x126f   : > { %v2405_v13 = vadd.f32 %v2900_v8, %v2404_v12  ;;  %v3098_v15 = vpop.f32.mrb[39].mxu1  ;;  %v2408_v16 = vadd.f32 %v2402_v10, %v5063_v5 }
0x1271   : > { %v2412_v17 = vsel %vm1111_vm2, %v2408_v16, 0.0  ;;  %v2409_v14 = vadd.f32 %v2405_v13, %v5065_v6 }
0x1272   : > { %2413 = vadd.xlane.f32.xlu0 %v2412_v17 }
0x1273   : > { %v2415_v18 = vsel %vm1111_vm2, %v2409_v14, 0.0 }
0x1274   : > { %2416 = vadd.xlane.f32.xlu1 %v2415_v18 }
0x12ff   : > { %v2414_v19 = vpop.xlane.xlu0 %2413 }
0x1300   : > { %v2418_v20 = vmul.f32 0.03125, %v2414_v19 }
0x1301   : > { %v2417_v21 = vpop.xlane.xlu1 %2416 }
0x1302   : > { %v2420_v23 = vsub.f32 %v2408_v16, %v2418_v20  ;;  %v2419_v24 = vmul.f32 0.03125, %v2417_v21 }
0x1304   : > { %v2421_v25 = vsub.f32 %v2409_v14, %v2419_v24  ;;  %v2422_v28 = vmul.f32 %v2420_v23, %v2420_v23 }
0x1306   : > { %v2424_v30 = vsel %vm1111_vm2, %v2422_v28, 0.0  ;;  %v2423_v31 = vmul.f32 %v2421_v25, %v2421_v25 }
0x1307   : > { %2425 = vadd.xlane.f32.xlu0 %v2424_v30 }
0x1308   : > { %v2427_v5 = vsel %vm1111_vm2, %v2423_v31, 0.0 }
0x1309   : > { %2428 = vadd.xlane.f32.xlu1 %v2427_v5 }
0x1394   : > { %v2426_v6 = vpop.xlane.xlu0 %2425 }
0x1395   : > { %v2430_v32 = vmul.f32 0.03125, %v2426_v6 }
0x1396   : > { %v2429_v35 = vpop.xlane.xlu1 %2428 }
0x1397   : > { %v2432_v37 = vadd.f32 1e-05, %v2430_v32  ;;  %v2431_v38 = vmul.f32 0.03125, %v2429_v35 }
0x1399   : > { %3339 = vrsqrt.f32 %v2432_v37  ;;  %v2433_v39 = vadd.f32 1e-05, %v2431_v38 }
0x139b   : > { %3341 = vrsqrt.f32 %v2433_v39 }
0x13a3   : > { %v3340_v40 = vpop.eup %3339 }
0x13a4   : > { %v2436_v36 = vmul.f32 %v3340_v40, %v2420_v23 }
0x13a5   : > { %v3342_v43 = vpop.eup %3341 }
0x13a6   : > { %v2444_v29 = vmul.f32 %v2906_v42, %v2436_v36  ;;  %v2437_v46 = vmul.f32 %v3342_v43, %v2421_v25  ;;  %2459 = sbr.rel (%p2908_p5) target bundleno = 5038 (0x13ae), region = 156 }
0x13a8   : > { %v2452_v47 = vadd.f32 %v2907_v45, %v2444_v29  ;;  %v2445_v48 = vmul.f32 %v2906_v42, %v2437_v46 }
0x13aa   : > { %2454 = vst.msk [vmem:[#allocation2] sm:$0xff] %vm1111_vm2, %v2452_v47  ;;  %v2453_v49 = vadd.f32 %v2907_v45, %v2445_v48 }
0x13ab   : > { %2461 = vst.msk [vmem:[%s4847_s22] sm:$0x1] (!%p2908_p5), %vm2460_vm10, %v2452_v47 }
0x13ac   : > { %2455 = vst.msk [vmem:[#allocation2 + $0x8] sm:$0xff] %vm1111_vm2, %v2453_v49 }
0x13ad   : > { %2462 = vst.msk [vmem:[%s4847_s22 + $0x1] sm:$0x1] %vm2460_vm10, %v2453_v49 }
0x13ae PF: > { %s5301_s10 = sld [smem:[#allocation46_spill]]  ;;  %s5302_s2 = sld [smem:[#allocation54_spill]] }
0x13af   : > { %s5303_s4 = sld [smem:[#allocation70_spill]]  ;;  %s2477_s26 = sshll.u32 %s4847_s22, 4  ;;  %s5103_s26 = int_to_ptr.vmem [resolvable:$true] %s2477_s26 }
0x13b0   : > { %s2464_s21 = scalar_lea.sflag [#allocation5], %s4719_s30  ;;  %s3791_s5 = scalar_lea.vmem %s5103_s26, 32 }
0x13b1   : > { %p3792_p10 = scmp.ne.s32.totalorder %s5103_s26, %s3791_s5  ;;  %s4013_s27 = smov [#allocation23]  }
0x13b2   : > { %s3795_s17 = sshll.u32 %s4013_s27, 4  ;;  %s3796_s17 = int_to_ptr.vmem [resolvable:$false] %s3795_s17 }
0x13b3   : > { %s3797_s3 = scalar_lea.vmem %s3796_s17, 64  ;;  %p3798_p1 = scmp.lt.s32.totalorder %s5103_s26, %s3796_s17 }
0x13b4   : > { %s2920_s19 = sshll.u32 %s5301_s10, 5  ;;  %p5304_p7 = scmp.ne.s32.totalorder %s5302_s2, 0 }
0x13b5   : > { %s5100_s20 = scalar_lea.hbm %s5303_s4, %s2920_s19  ;;  %p3799_p13 = scmp.lt.s32.totalorder %s3797_s3, %s3791_s5 }
0x13b6   : > { %p3793_p9 = pnand %p3792_p10, %p5304_p7 }
0x13b7   : > { %p3800_p3 = por %p3799_p13, %p3798_p1 }
0x13b8   : > { %p3794_p12 = pneg %p3793_p9 }
0x13ba   : > { %p3801_p2 = pnand %p3800_p3, %p3794_p12 }
0x13bc   : > { %3804 = shalt.err (!%p3801_p2)
}
0x13bd   : > { %s3805_s22 = scalar_lea.hbm %s5100_s20, 32  ;;  %s3809_s11 = scalar_lea.hbm %s5303_s4, 64 }
0x13be   : > { %p3806_p8 = scmp.ne.s32.totalorder %s5100_s20, %s3805_s22  ;;  %p3810_p11 = scmp.lt.u32.totalorder %s5100_s20, %s5303_s4 }
0x13bf   : > { %p3811_p6 = scmp.lt.u32.totalorder %s3809_s11, %s3805_s22  ;;  %p3813_p10 = scmp.lt.u32.totalorder %s3805_s22, %s5100_s20 }
0x13c0   : > { %p3807_p0 = pnand %p3806_p8, %p5304_p7 }
0x13c1   : > { %p3812_p5 = por %p3811_p6, %p3810_p11 }
0x13c2   : > { %p3808_p4 = pneg %p3807_p0 }
0x13c3   : > { %p3814_p9 = por %p3813_p10, %p3812_p5 }
0x13c5   : > { %p3815_p12 = pnand %p3814_p9, %p3808_p4 }
0x13c7   : > { %3818 = shalt.err (!%p3815_p12)
}
0x13c8   : > { %s4014_s28 = smov 1  }
0x13c9   : > { %3135 = dma.vmem_to_hbm [thread:$0]  (%p5304_p7), %s5103_s26, 32, %s5100_s20, %s2464_s21, %s4011_s25, %s4011_s25, %s4014_s28  }
0x13ca PF: > { %s5305_s10 = sld [smem:[#allocation42_spill]]  ;;  %s5306_s19 = sld [smem:[#allocation55_spill]] }
0x13cb   : > { %p3152_p1 = scmp.ge.s32.totalorder %s3973_s0, 2 }
0x13d0   : > { %s2492_s14 = sand.u32 1, %s5305_s10   ;;  %p5307_p13 = scmp.ne.s32.totalorder %s5306_s19, 0 }
0x13d1   : > { %s2493_s6 = scalar_lea.sflag [#allocation5], %s2492_s14 }
0x13d2   : > { %p3145_p3 = pnand %p3152_p1, %p5307_p13 }
0x13d4   : > { %3928 = dma.done.wait (!%p3145_p3), %s2493_s6, 32  }
0x13d5   : > { %3930 = vsyncadd (!%p3145_p3), %s2493_s6, 4294967264  ;;  %s36_s0 = sadd.s32 1, %s3973_s0   ;;  %s5308_s21 = sld [smem:[#allocation41_spill]] }
0x13d6   : > { %p33_p2 = scmp.ge.s32.totalorder %s36_s0, 6   ;;  %s5309_s30 = sld [smem:[#allocation51_spill]] }
0x13d7   : > { %s5310_s24 = sld [smem:[#allocation43_spill]]  ;;  %s5311_s25 = sld [smem:[#allocation44_spill]] }
0x13d8   : > { %s5312_s26 = sld [smem:[#allocation52_spill]]  ;;  %s5313_s28 = sld [smem:[#allocation47_spill]] }
0x13d9   : > { %s5314_s2 = sld [smem:[#allocation48_spill]]  ;;  %s5315_s20 = sld [smem:[#allocation49_spill]] }
0x13da   : > { %s5316_s22 = smov %s3941_s23  ;;  %s5318_s27 = smov %s3965_s29 }
0x13db   :  { %35 = sbr.rel (!%p33_p2) target bundleno = 28 (0x1c), region = 290 }
0x13dc   : > { %s5317_s23 = smov %s5309_s30 }
0x13df   : > { %s5319_s29 = smov %s5314_s2  ;;  %s5320_s30 = smov %s5315_s20 }
0x13e2   :  { %2498 = vsyncpa [#allocation4], 1 }
0x13e3   :  { %2500 = vsyncpa [#allocation4 + $0x1], 1 }
0x13e4   :  { %2501 = vsyncpa [#allocation7], 1 }
0x13e5   :  { %2503 = vsyncpa [#allocation7 + $0x1], 1 }
0x13e6   :  { %2504 = vsyncpa [#allocation10], 1 }
0x13e7   :  { %2505 = vsyncpa [#allocation5], 1 }
0x13e8   :  { %2507 = vsyncpa [#allocation5 + $0x1], 1 }

</bundles_post_ra>
